<compile_context>
chip_gen: v6e
topology: v6e:2x2x1
jax: 0.10.0
libtpu: 0.0.40
codegen_flags: <defaults>
</compile_context>

<pallas_src>
import functools

import jax
import jax.numpy as jnp
from jax.experimental import pallas as pl
from jax.experimental.pallas import tpu as pltpu

PAD = 0


def _round_up(x, m):
    return (x + m - 1) // m * m


# ----------------------------------------------------------------------------
# Pallas kernel: LSTM recurrence + fused tag projection in one invocation.
# ----------------------------------------------------------------------------
def _lstm_tagger_kernel(xg_ref, mask_ref, whh_ref, wproj_ref, bproj_ref, out_ref):
    """xg_ref: (T, Bs, 4H) bf16 precomputed x@W_ih + b (time-major).
    mask_ref: (T, Bs, 1) f32 0/1 validity mask (t < length[b]).
    whh_ref:  (H, 4H) bf16.   wproj_ref: (H, Kpad) bf16.   bproj_ref: (1, Kpad) f32.
    out_ref:  (T, Bs, Kpad) f32 tag_space (lane-dense, Kpad % 128 == 0)."""
    T = xg_ref.shape[0]
    Bs = xg_ref.shape[1]
    H = whh_ref.shape[0]

    # Hoisted loads — reused every step, kept out of the recurrence loop.
    whh = whh_ref[...]       # (H, 4H)  bf16 MXU operand
    wproj = wproj_ref[...]   # (H, Kp)  bf16 MXU operand
    bproj = bproj_ref[...]   # (1, Kp)  f32

    def step(t, carry):
        h_prev, c_prev = carry                       # f32 (Bs, H)
        # Serial critical path: one small bf16 MXU matmul (f32 accum) + f32 gates.
        gates = xg_ref[t].astype(jnp.float32) + jnp.dot(
            h_prev.astype(jnp.bfloat16), whh,
            preferred_element_type=jnp.float32)      # (Bs, 4H) f32
        # TODO(synk): for production sizes pad/reorder so H is a multiple of 128
        # and these gate slices are vreg-aligned (no sub-128-lane XLU shifts).
        i_g = jax.nn.sigmoid(gates[:, 0 * H:1 * H])
        f_g = jax.nn.sigmoid(gates[:, 1 * H:2 * H])
        g_g = jnp.tanh(gates[:, 2 * H:3 * H])
        o_g = jax.nn.sigmoid(gates[:, 3 * H:4 * H])
        c_new = f_g * c_prev + i_g * g_g
        h_new = o_g * jnp.tanh(c_new)

        # packed-sequence semantics: state freezes and output is zeroed once
        # t >= length[b]; mask is a precomputed 0/1 f32 load (no per-step compare).
        m = mask_ref[t]                              # (Bs, 1) f32
        nm = 1.0 - m
        c_nxt = m * c_new + nm * c_prev
        h_nxt = m * h_new + nm * h_prev

        # Fused tag projection — NOT on the recurrence dependency chain (nothing
        # feeds back into the carry), so it overlaps with the next serial step.
        # Lane-dense (Kpad multiple of 128) store; hs never touches HBM.
        h_out = (m * h_new).astype(jnp.bfloat16)
        out_ref[t] = (jnp.dot(h_out, wproj, preferred_element_type=jnp.float32)
                      + bproj).astype(out_ref.dtype)
        return (h_nxt, c_nxt)

    h0 = jnp.zeros((Bs, H), jnp.float32)
    c0 = jnp.zeros((Bs, H), jnp.float32)
    # Full unroll only for small static T (scheduler visibility + static stores);
    # partial unroll for long T to avoid vreg-spill / instruction-memory blowup.
    unroll = True if T <= 32 else 8
    jax.lax.fori_loop(0, T, step, (h0, c0), unroll=unroll)


def _lstm_recurrence_pallas(xg_tm, mask_tm, w_hh_bf16, w_proj_pad, b_proj_pad,
                            *, batch_shards=1):
    T, B, G = xg_tm.shape
    H = w_hh_bf16.shape[0]
    Kp = w_proj_pad.shape[1]
    assert B % batch_shards == 0, "batch must divide evenly into shards"
    Bs = B // batch_shards
    if batch_shards > 1:
        # v7x only (2 TensorCores): shard size must stay sublane-aligned.
        assert Bs % 8 == 0, "batch shard size must be a multiple of 8 sublanes"

    return pl.pallas_call(
        _lstm_tagger_kernel,
        out_shape=jax.ShapeDtypeStruct((T, B, Kp), jnp.float32),
        grid=(batch_shards,),
        in_specs=[
            pl.BlockSpec((T, Bs, G), lambda i: (0, i, 0)),   # xg (bf16)
            pl.BlockSpec((T, Bs, 1), lambda i: (0, i, 0)),   # validity mask
            pl.BlockSpec((H, G), lambda i: (0, 0)),          # W_hh (bf16)
            pl.BlockSpec((H, Kp), lambda i: (0, 0)),         # W_proj padded (bf16)
            pl.BlockSpec((1, Kp), lambda i: (0, 0)),         # b_proj padded (f32)
        ],
        out_specs=pl.BlockSpec((T, Bs, Kp), lambda i: (0, i, 0)),
        compiler_params=pltpu.CompilerParams(
            # Batch shards are independent recurrences -> megacore-parallel on
            # v7x; with batch_shards=1 this is a single invocation (no per-step
            # grid overhead on v5e/v6e).
            dimension_semantics=("parallel",),
            # Whole-array BlockSpecs are double-buffered; keep the scoped VMEM
            # budget explicit. Re-derive (or tile the batch axis) once the xg
            # buffer approaches ~8-12 MiB, especially on v7x (64 MiB physical).
            vmem_limit_bytes=32 * 1024 * 1024,
        ),
    )(xg_tm, mask_tm, w_hh_bf16, w_proj_pad, b_proj_pad)


# ----------------------------------------------------------------------------
# Wrapper: embeddings + hoisted input projection (time-major, bf16 MXU operands)
# in plain JAX; recurrence + tag projection fused in the Pallas kernel.
# ----------------------------------------------------------------------------
def lstm_tagger_forward(params, stress, wb, syllables, lengths, *, batch_shards=1):
    B, T = stress.shape
    H = params["w_hh"].shape[0]
    K = params["w_proj"].shape[1]
    Kp = _round_up(K, 128)

    # Time-major from the start: transpose only the tiny (B,T) int id arrays,
    # never a big activation tensor.
    s_emb = params["stress_emb"][stress.T]        # (T, B, E)
    w_emb = params["wb_emb"][wb.T]                # (T, B, E)
    y_emb = params["syll_emb"][syllables.T]       # (T, B, E)
    embs_tm = jnp.concatenate([s_emb, w_emb, y_emb], axis=-1)   # (T, B, 3E)
    # dropout(p, training=False) == identity in eval mode.

    # Hoisted input projection for ALL timesteps: bf16 operands, f32 accumulate,
    # stored bf16 to halve the kernel input DMA. Natural dot_general layout
    # (t,b,g) -> no transpose copies.
    b_comb = (params["b_ih"] + params["b_hh"]).reshape(1, 1, -1)
    xg_tm = (jnp.einsum("tbd,dg->tbg",
                        embs_tm.astype(jnp.bfloat16),
                        params["w_ih"].astype(jnp.bfloat16),
                        preferred_element_type=jnp.float32)
             + b_comb).astype(jnp.bfloat16)                     # (T, B, 4H) bf16

    # Precomputed 0/1 validity mask (pack/pad_packed_sequence semantics).
    mask_tm = (jnp.arange(T)[:, None] < lengths[None, :]
               ).astype(jnp.float32)[:, :, None]                # (T, B, 1)

    # Tag projection weights padded to a lane-dense (multiple of 128) width;
    # padded columns are exactly zero and sliced off below.
    w_proj_pad = jnp.zeros((H, Kp), jnp.bfloat16).at[:, :K].set(
        params["w_proj"].astype(jnp.bfloat16))
    b_proj_pad = jnp.zeros((1, Kp), jnp.float32).at[0, :K].set(params["b_proj"])

    tag_tm = _lstm_recurrence_pallas(
        xg_tm, mask_tm, params["w_hh"].astype(jnp.bfloat16),
        w_proj_pad, b_proj_pad, batch_shards=batch_shards)      # (T, B, Kp)

    # Only the small (T,B,K) result gets transposed back to batch-first.
    tag_space = jnp.transpose(tag_tm[:, :, :K], (1, 0, 2))      # (B, T, K)
    preds = jnp.argmax(tag_space, axis=2)                       # (B, T)
    # TODO(synk): utils.chop_padding returns a ragged Python list; we return
    # padded preds plus a validity mask instead (same information).
    mask = jnp.arange(T)[None, :] < lengths[:, None]
    return {"tag_space": tag_space, "tags": preds, "tag_mask": mask}


# ----------------------------------------------------------------------------
# Pure-JAX reference (lax.scan) mirroring the bf16-MXU / f32-accumulate policy.
# ----------------------------------------------------------------------------
def _reference(params, stress, wb, syllables, lengths):
    s_emb = params["stress_emb"][stress]
    w_emb = params["wb_emb"][wb]
    y_emb = params["syll_emb"][syllables]
    embs = jnp.concatenate([s_emb, w_emb, y_emb], axis=-1)      # (B, T, 3E)
    B, T, _ = embs.shape
    H = params["w_hh"].shape[0]
    b = (params["b_ih"] + params["b_hh"])[None, :]
    whh = params["w_hh"].astype(jnp.bfloat16)

    xg = (jnp.einsum("btd,dg->btg", embs.astype(jnp.bfloat16),
                     params["w_ih"].astype(jnp.bfloat16),
                     preferred_element_type=jnp.float32) + b)
    xg = xg.astype(jnp.bfloat16).astype(jnp.float32)            # match kernel storage

    def step(carry, inp):
        h, c = carry
        xg_t, t = inp
        gates = xg_t + jnp.dot(h.astype(jnp.bfloat16), whh,
                               preferred_element_type=jnp.float32)
        i = jax.nn.sigmoid(gates[:, 0 * H:1 * H])
        f = jax.nn.sigmoid(gates[:, 1 * H:2 * H])
        g = jnp.tanh(gates[:, 2 * H:3 * H])
        o = jax.nn.sigmoid(gates[:, 3 * H:4 * H])
        c_new = f * c + i * g
        h_new = o * jnp.tanh(c_new)
        valid = (lengths > t)[:, None]
        c = jnp.where(valid, c_new, c)
        h = jnp.where(valid, h_new, h)
        h_out = jnp.where(valid, h_new, 0.0)
        return (h, c), h_out

    init = (jnp.zeros((B, H), jnp.float32), jnp.zeros((B, H), jnp.float32))
    _, hs = jax.lax.scan(step, init,
                         (jnp.transpose(xg, (1, 0, 2)), jnp.arange(T)))
    hs = jnp.transpose(hs, (1, 0, 2))                           # (B, T, H)
    tag = (jnp.einsum("bth,hk->btk", hs.astype(jnp.bfloat16),
                      params["w_proj"].astype(jnp.bfloat16),
                      preferred_element_type=jnp.float32)
           + params["b_proj"][None, None, :])
    return tag


# ----------------------------------------------------------------------------
# Deterministic parameter init + demo run.
# ----------------------------------------------------------------------------
def init_params(key, embedding_dim, hidden_dim, stress_size, wb_size,
                syllable_vocab, tagset_size):
    ks = jax.random.split(key, 9)
    E, H = embedding_dim, hidden_dim
    D = 3 * E

    def emb(k, n, d):
        w = 0.1 * jax.random.normal(k, (n, d), jnp.float32)
        return w.at[PAD].set(0.0)                               # padding_idx=PAD

    return {
        "stress_emb": emb(ks[0], stress_size, E),
        "wb_emb": emb(ks[1], wb_size, E),
        "syll_emb": emb(ks[2], syllable_vocab, E),
        # stored pre-transposed relative to PyTorch (in, out) layout
        "w_ih": 0.1 * jax.random.normal(ks[3], (D, 4 * H), jnp.float32),
        "w_hh": 0.1 * jax.random.normal(ks[4], (H, 4 * H), jnp.float32),
        "b_ih": 0.1 * jax.random.normal(ks[5], (4 * H,), jnp.float32),
        "b_hh": 0.1 * jax.random.normal(ks[6], (4 * H,), jnp.float32),
        "w_proj": 0.1 * jax.random.normal(ks[7], (H, tagset_size), jnp.float32),
        "b_proj": 0.1 * jax.random.normal(ks[8], (tagset_size,), jnp.float32),
    }


if __name__ == "__main__":
    key = jax.random.PRNGKey(0)
    B, T = 2, 8
    embedding_dim, hidden_dim = 16, 32
    stress_size, wb_size, syllable_vocab, tagset_size = 5, 4, 50, 16

    k_params, k_s, k_w, k_y = jax.random.split(key, 4)
    params = init_params(k_params, embedding_dim, hidden_dim,
                         stress_size, wb_size, syllable_vocab, tagset_size)

    lengths = jnp.array([8, 5], dtype=jnp.int32)   # sorted desc (enforce_sorted)
    pos = jnp.arange(T)[None, :]
    valid = pos < lengths[:, None]
    stress = jnp.where(valid, jax.random.randint(k_s, (B, T), 1, stress_size), PAD)
    wb = jnp.where(valid, jax.random.randint(k_w, (B, T), 1, wb_size), PAD)
    syllables = jnp.where(valid,
                          jax.random.randint(k_y, (B, T), 1, syllable_vocab), PAD)

    out = jax.jit(functools.partial(lstm_tagger_forward, params))(
        stress, wb, syllables, lengths)
    jax.block_until_ready(out)

    ref = _reference(params, stress, wb, syllables, lengths)
    # both paths use bf16 MXU operands with f32 accumulation; tolerance covers
    # MXU-vs-XLA accumulation-order differences only.
    assert jnp.allclose(out["tag_space"], ref, atol=2e-3, rtol=2e-3), "mismatch"

    print("KERNEL_OK")
</pallas_src>

<mosaic_0001>
module attributes {stable_mosaic.version = 11 : i64} {
  func.func @_lstm_tagger_kernel(%arg0: i32, %arg1: memref<8x2x128xbf16, #tpu.memory_space<vmem>>, %arg2: memref<8x2x1xf32, #tpu.memory_space<vmem>>, %arg3: memref<32x128xbf16, #tpu.memory_space<vmem>>, %arg4: memref<32x128xbf16, #tpu.memory_space<vmem>>, %arg5: memref<1x128xf32, #tpu.memory_space<vmem>>, %arg6: memref<8x2x128xf32, #tpu.memory_space<vmem>>) attributes {dimension_semantics = [#tpu.dimension_semantics<parallel>], iteration_bounds = array<i64: 1>, scalar_prefetch = 0 : i64, scratch_operands = 0 : i64, tpu.core_type = #tpu.core_type<tc>, window_params = [{transform_indices = @transform_0, window_bounds = array<i64: 8, 2, 128>}, {transform_indices = @transform_1, window_bounds = array<i64: 8, 2, 1>}, {pipeline_mode = #tpu.pipeline_mode<synchronous>, transform_indices = @transform_2, window_bounds = array<i64: 32, 128>}, {pipeline_mode = #tpu.pipeline_mode<synchronous>, transform_indices = @transform_3, window_bounds = array<i64: 32, 128>}, {pipeline_mode = #tpu.pipeline_mode<synchronous>, transform_indices = @transform_4, window_bounds = array<i64: 1, 128>}, {transform_indices = @transform_5, window_bounds = array<i64: 8, 2, 128>}]} {
    %c0 = arith.constant 0 : index
    %c0_0 = arith.constant 0 : index
    %0 = vector.load %arg3[%c0, %c0_0] : memref<32x128xbf16, #tpu.memory_space<vmem>>, vector<32x128xbf16>
    %c0_1 = arith.constant 0 : index
    %c0_2 = arith.constant 0 : index
    %1 = vector.load %arg4[%c0_1, %c0_2] : memref<32x128xbf16, #tpu.memory_space<vmem>>, vector<32x128xbf16>
    %c0_3 = arith.constant 0 : index
    %c0_4 = arith.constant 0 : index
    %2 = vector.load %arg5[%c0_3, %c0_4] : memref<1x128xf32, #tpu.memory_space<vmem>>, vector<1x128xf32>
    %cst = arith.constant 0.000000e+00 : f32
    %3 = vector.broadcast %cst : f32 to vector<2x32xf32>
    %cst_5 = arith.constant 0.000000e+00 : f32
    %4 = vector.broadcast %cst_5 : f32 to vector<2x32xf32>
    %c0_i32 = arith.constant 0 : i32
    %5 = arith.index_cast %c0_i32 : i32 to index
    %c0_6 = arith.constant 0 : index
    %c0_7 = arith.constant 0 : index
    %6 = vector.load %arg1[%5, %c0_6, %c0_7] : memref<8x2x128xbf16, #tpu.memory_space<vmem>>, vector<1x2x128xbf16>
    %7 = vector.shape_cast %6 : vector<1x2x128xbf16> to vector<2x128xbf16>
    %8 = arith.extf %7 : vector<2x128xbf16> to vector<2x128xf32>
    %9 = arith.truncf %3 : vector<2x32xf32> to vector<2x32xbf16>
    %cst_8 = arith.constant dense<0.000000e+00> : vector<2x128xf32>
    %10 = tpu.matmul %9, %0, %cst_8 {dimension_numbers = #tpu.dot_dimension_numbers<[1], [0], [0], [1], [0, 0, 1, 1], [], []>} : vector<2x32xbf16>, vector<32x128xbf16>, vector<2x128xf32> -> vector<2x128xf32>
    %11 = arith.addf %8, %10 : vector<2x128xf32>
    %12 = vector.extract_strided_slice %11 {offsets = [0, 0], sizes = [2, 32], strides = [1, 1]} : vector<2x128xf32> to vector<2x32xf32>
    %13 = arith.negf %12 : vector<2x32xf32>
    %14 = math.exp %13 : vector<2x32xf32>
    %cst_9 = arith.constant 1.000000e+00 : f32
    %15 = vector.broadcast %cst_9 : f32 to vector<2x32xf32>
    %16 = arith.addf %15, %14 : vector<2x32xf32>
    %17 = arith.divf %15, %16 : vector<2x32xf32>
    %18 = vector.extract_strided_slice %11 {offsets = [0, 32], sizes = [2, 32], strides = [1, 1]} : vector<2x128xf32> to vector<2x32xf32>
    %19 = arith.negf %18 : vector<2x32xf32>
    %20 = math.exp %19 : vector<2x32xf32>
    %cst_10 = arith.constant 1.000000e+00 : f32
    %21 = vector.broadcast %cst_10 : f32 to vector<2x32xf32>
    %22 = arith.addf %21, %20 : vector<2x32xf32>
    %23 = arith.divf %21, %22 : vector<2x32xf32>
    %24 = vector.extract_strided_slice %11 {offsets = [0, 64], sizes = [2, 32], strides = [1, 1]} : vector<2x128xf32> to vector<2x32xf32>
    %25 = math.tanh %24 : vector<2x32xf32>
    %26 = vector.extract_strided_slice %11 {offsets = [0, 96], sizes = [2, 32], strides = [1, 1]} : vector<2x128xf32> to vector<2x32xf32>
    %27 = arith.negf %26 : vector<2x32xf32>
    %28 = math.exp %27 : vector<2x32xf32>
    %cst_11 = arith.constant 1.000000e+00 : f32
    %29 = vector.broadcast %cst_11 : f32 to vector<2x32xf32>
    %30 = arith.addf %29, %28 : vector<2x32xf32>
    %31 = arith.divf %29, %30 : vector<2x32xf32>
    %32 = arith.mulf %23, %4 : vector<2x32xf32>
    %33 = arith.mulf %17, %25 : vector<2x32xf32>
    %34 = arith.addf %32, %33 : vector<2x32xf32>
    %35 = math.tanh %34 : vector<2x32xf32>
    %36 = arith.mulf %31, %35 : vector<2x32xf32>
    %37 = arith.index_cast %c0_i32 : i32 to index
    %c0_12 = arith.constant 0 : index
    %c0_13 = arith.constant 0 : index
    %38 = vector.load %arg2[%37, %c0_12, %c0_13] : memref<8x2x1xf32, #tpu.memory_space<vmem>>, vector<1x2x1xf32>
    %39 = vector.shape_cast %38 : vector<1x2x1xf32> to vector<2x1xf32>
    %cst_14 = arith.constant 1.000000e+00 : f32
    %40 = vector.broadcast %cst_14 : f32 to vector<2x1xf32>
    %41 = arith.subf %40, %39 : vector<2x1xf32>
    %42 = vector.broadcast %39 : vector<2x1xf32> to vector<2x32xf32>
    %43 = arith.mulf %42, %34 : vector<2x32xf32>
    %44 = vector.broadcast %41 : vector<2x1xf32> to vector<2x32xf32>
    %45 = arith.mulf %44, %4 : vector<2x32xf32>
    %46 = arith.addf %43, %45 : vector<2x32xf32>
    %47 = vector.broadcast %39 : vector<2x1xf32> to vector<2x32xf32>
    %48 = arith.mulf %47, %36 : vector<2x32xf32>
    %49 = vector.broadcast %41 : vector<2x1xf32> to vector<2x32xf32>
    %50 = arith.mulf %49, %3 : vector<2x32xf32>
    %51 = arith.addf %48, %50 : vector<2x32xf32>
    %52 = vector.broadcast %39 : vector<2x1xf32> to vector<2x32xf32>
    %53 = arith.mulf %52, %36 : vector<2x32xf32>
    %54 = arith.truncf %53 : vector<2x32xf32> to vector<2x32xbf16>
    %cst_15 = arith.constant dense<0.000000e+00> : vector<2x128xf32>
    %55 = tpu.matmul %54, %1, %cst_15 {dimension_numbers = #tpu.dot_dimension_numbers<[1], [0], [0], [1], [0, 0, 1, 1], [], []>} : vector<2x32xbf16>, vector<32x128xbf16>, vector<2x128xf32> -> vector<2x128xf32>
    %56 = vector.broadcast %2 : vector<1x128xf32> to vector<2x128xf32>
    %57 = arith.addf %55, %56 : vector<2x128xf32>
    %58 = arith.index_cast %c0_i32 : i32 to index
    %c0_16 = arith.constant 0 : index
    %c0_17 = arith.constant 0 : index
    %59 = vector.load %arg6[%58, %c0_16, %c0_17] : memref<8x2x128xf32, #tpu.memory_space<vmem>>, vector<1x2x128xf32>
    %60 = vector.shape_cast %59 : vector<1x2x128xf32> to vector<2x128xf32>
    %61 = vector.shape_cast %57 : vector<2x128xf32> to vector<1x2x128xf32>
    tpu.vector_store %arg6[%58, %c0_16, %c0_17], %61 {strides = array<i32>} : memref<8x2x128xf32, #tpu.memory_space<vmem>>, vector<1x2x128xf32>,
    %c1_i32 = arith.constant 1 : i32
    %62 = arith.index_cast %c1_i32 : i32 to index
    %c0_18 = arith.constant 0 : index
    %c0_19 = arith.constant 0 : index
    %63 = vector.load %arg1[%62, %c0_18, %c0_19] : memref<8x2x128xbf16, #tpu.memory_space<vmem>>, vector<1x2x128xbf16>
    %64 = vector.shape_cast %63 : vector<1x2x128xbf16> to vector<2x128xbf16>
    %65 = arith.extf %64 : vector<2x128xbf16> to vector<2x128xf32>
    %66 = arith.truncf %51 : vector<2x32xf32> to vector<2x32xbf16>
    %cst_20 = arith.constant dense<0.000000e+00> : vector<2x128xf32>
    %67 = tpu.matmul %66, %0, %cst_20 {dimension_numbers = #tpu.dot_dimension_numbers<[1], [0], [0], [1], [0, 0, 1, 1], [], []>} : vector<2x32xbf16>, vector<32x128xbf16>, vector<2x128xf32> -> vector<2x128xf32>
    %68 = arith.addf %65, %67 : vector<2x128xf32>
    %69 = vector.extract_strided_slice %68 {offsets = [0, 0], sizes = [2, 32], strides = [1, 1]} : vector<2x128xf32> to vector<2x32xf32>
    %70 = arith.negf %69 : vector<2x32xf32>
    %71 = math.exp %70 : vector<2x32xf32>
    %cst_21 = arith.constant 1.000000e+00 : f32
    %72 = vector.broadcast %cst_21 : f32 to vector<2x32xf32>
    %73 = arith.addf %72, %71 : vector<2x32xf32>
    %74 = arith.divf %72, %73 : vector<2x32xf32>
    %75 = vector.extract_strided_slice %68 {offsets = [0, 32], sizes = [2, 32], strides = [1, 1]} : vector<2x128xf32> to vector<2x32xf32>
    %76 = arith.negf %75 : vector<2x32xf32>
    %77 = math.exp %76 : vector<2x32xf32>
    %cst_22 = arith.constant 1.000000e+00 : f32
    %78 = vector.broadcast %cst_22 : f32 to vector<2x32xf32>
    %79 = arith.addf %78, %77 : vector<2x32xf32>
    %80 = arith.divf %78, %79 : vector<2x32xf32>
    %81 = vector.extract_strided_slice %68 {offsets = [0, 64], sizes = [2, 32], strides = [1, 1]} : vector<2x128xf32> to vector<2x32xf32>
    %82 = math.tanh %81 : vector<2x32xf32>
    %83 = vector.extract_strided_slice %68 {offsets = [0, 96], sizes = [2, 32], strides = [1, 1]} : vector<2x128xf32> to vector<2x32xf32>
    %84 = arith.negf %83 : vector<2x32xf32>
    %85 = math.exp %84 : vector<2x32xf32>
    %cst_23 = arith.constant 1.000000e+00 : f32
    %86 = vector.broadcast %cst_23 : f32 to vector<2x32xf32>
    %87 = arith.addf %86, %85 : vector<2x32xf32>
    %88 = arith.divf %86, %87 : vector<2x32xf32>
    %89 = arith.mulf %80, %46 : vector<2x32xf32>
    %90 = arith.mulf %74, %82 : vector<2x32xf32>
    %91 = arith.addf %89, %90 : vector<2x32xf32>
    %92 = math.tanh %91 : vector<2x32xf32>
    %93 = arith.mulf %88, %92 : vector<2x32xf32>
    %94 = arith.index_cast %c1_i32 : i32 to index
    %c0_24 = arith.constant 0 : index
    %c0_25 = arith.constant 0 : index
    %95 = vector.load %arg2[%94, %c0_24, %c0_25] : memref<8x2x1xf32, #tpu.memory_space<vmem>>, vector<1x2x1xf32>
    %96 = vector.shape_cast %95 : vector<1x2x1xf32> to vector<2x1xf32>
    %cst_26 = arith.constant 1.000000e+00 : f32
    %97 = vector.broadcast %cst_26 : f32 to vector<2x1xf32>
    %98 = arith.subf %97, %96 : vector<2x1xf32>
    %99 = vector.broadcast %96 : vector<2x1xf32> to vector<2x32xf32>
    %100 = arith.mulf %99, %91 : vector<2x32xf32>
    %101 = vector.broadcast %98 : vector<2x1xf32> to vector<2x32xf32>
    %102 = arith.mulf %101, %46 : vector<2x32xf32>
    %103 = arith.addf %100, %102 : vector<2x32xf32>
    %104 = vector.broadcast %96 : vector<2x1xf32> to vector<2x32xf32>
    %105 = arith.mulf %104, %93 : vector<2x32xf32>
    %106 = vector.broadcast %98 : vector<2x1xf32> to vector<2x32xf32>
    %107 = arith.mulf %106, %51 : vector<2x32xf32>
    %108 = arith.addf %105, %107 : vector<2x32xf32>
    %109 = vector.broadcast %96 : vector<2x1xf32> to vector<2x32xf32>
    %110 = arith.mulf %109, %93 : vector<2x32xf32>
    %111 = arith.truncf %110 : vector<2x32xf32> to vector<2x32xbf16>
    %cst_27 = arith.constant dense<0.000000e+00> : vector<2x128xf32>
    %112 = tpu.matmul %111, %1, %cst_27 {dimension_numbers = #tpu.dot_dimension_numbers<[1], [0], [0], [1], [0, 0, 1, 1], [], []>} : vector<2x32xbf16>, vector<32x128xbf16>, vector<2x128xf32> -> vector<2x128xf32>
    %113 = vector.broadcast %2 : vector<1x128xf32> to vector<2x128xf32>
    %114 = arith.addf %112, %113 : vector<2x128xf32>
    %115 = arith.index_cast %c1_i32 : i32 to index
    %c0_28 = arith.constant 0 : index
    %c0_29 = arith.constant 0 : index
    %116 = vector.load %arg6[%115, %c0_28, %c0_29] : memref<8x2x128xf32, #tpu.memory_space<vmem>>, vector<1x2x128xf32>
    %117 = vector.shape_cast %116 : vector<1x2x128xf32> to vector<2x128xf32>
    %118 = vector.shape_cast %114 : vector<2x128xf32> to vector<1x2x128xf32>
    tpu.vector_store %arg6[%115, %c0_28, %c0_29], %118 {strides = array<i32>} : memref<8x2x128xf32, #tpu.memory_space<vmem>>, vector<1x2x128xf32>,
    %c2_i32 = arith.constant 2 : i32
    %119 = arith.index_cast %c2_i32 : i32 to index
    %c0_30 = arith.constant 0 : index
    %c0_31 = arith.constant 0 : index
    %120 = vector.load %arg1[%119, %c0_30, %c0_31] : memref<8x2x128xbf16, #tpu.memory_space<vmem>>, vector<1x2x128xbf16>
    %121 = vector.shape_cast %120 : vector<1x2x128xbf16> to vector<2x128xbf16>
    %122 = arith.extf %121 : vector<2x128xbf16> to vector<2x128xf32>
    %123 = arith.truncf %108 : vector<2x32xf32> to vector<2x32xbf16>
    %cst_32 = arith.constant dense<0.000000e+00> : vector<2x128xf32>
    %124 = tpu.matmul %123, %0, %cst_32 {dimension_numbers = #tpu.dot_dimension_numbers<[1], [0], [0], [1], [0, 0, 1, 1], [], []>} : vector<2x32xbf16>, vector<32x128xbf16>, vector<2x128xf32> -> vector<2x128xf32>
    %125 = arith.addf %122, %124 : vector<2x128xf32>
    %126 = vector.extract_strided_slice %125 {offsets = [0, 0], sizes = [2, 32], strides = [1, 1]} : vector<2x128xf32> to vector<2x32xf32>
    %127 = arith.negf %126 : vector<2x32xf32>
    %128 = math.exp %127 : vector<2x32xf32>
    %cst_33 = arith.constant 1.000000e+00 : f32
    %129 = vector.broadcast %cst_33 : f32 to vector<2x32xf32>
    %130 = arith.addf %129, %128 : vector<2x32xf32>
    %131 = arith.divf %129, %130 : vector<2x32xf32>
    %132 = vector.extract_strided_slice %125 {offsets = [0, 32], sizes = [2, 32], strides = [1, 1]} : vector<2x128xf32> to vector<2x32xf32>
    %133 = arith.negf %132 : vector<2x32xf32>
    %134 = math.exp %133 : vector<2x32xf32>
    %cst_34 = arith.constant 1.000000e+00 : f32
    %135 = vector.broadcast %cst_34 : f32 to vector<2x32xf32>
    %136 = arith.addf %135, %134 : vector<2x32xf32>
    %137 = arith.divf %135, %136 : vector<2x32xf32>
    %138 = vector.extract_strided_slice %125 {offsets = [0, 64], sizes = [2, 32], strides = [1, 1]} : vector<2x128xf32> to vector<2x32xf32>
    %139 = math.tanh %138 : vector<2x32xf32>
    %140 = vector.extract_strided_slice %125 {offsets = [0, 96], sizes = [2, 32], strides = [1, 1]} : vector<2x128xf32> to vector<2x32xf32>
    %141 = arith.negf %140 : vector<2x32xf32>
    %142 = math.exp %141 : vector<2x32xf32>
    %cst_35 = arith.constant 1.000000e+00 : f32
    %143 = vector.broadcast %cst_35 : f32 to vector<2x32xf32>
    %144 = arith.addf %143, %142 : vector<2x32xf32>
    %145 = arith.divf %143, %144 : vector<2x32xf32>
    %146 = arith.mulf %137, %103 : vector<2x32xf32>
    %147 = arith.mulf %131, %139 : vector<2x32xf32>
    %148 = arith.addf %146, %147 : vector<2x32xf32>
    %149 = math.tanh %148 : vector<2x32xf32>
    %150 = arith.mulf %145, %149 : vector<2x32xf32>
    %151 = arith.index_cast %c2_i32 : i32 to index
    %c0_36 = arith.constant 0 : index
    %c0_37 = arith.constant 0 : index
    %152 = vector.load %arg2[%151, %c0_36, %c0_37] : memref<8x2x1xf32, #tpu.memory_space<vmem>>, vector<1x2x1xf32>
    %153 = vector.shape_cast %152 : vector<1x2x1xf32> to vector<2x1xf32>
    %cst_38 = arith.constant 1.000000e+00 : f32
    %154 = vector.broadcast %cst_38 : f32 to vector<2x1xf32>
    %155 = arith.subf %154, %153 : vector<2x1xf32>
    %156 = vector.broadcast %153 : vector<2x1xf32> to vector<2x32xf32>
    %157 = arith.mulf %156, %148 : vector<2x32xf32>
    %158 = vector.broadcast %155 : vector<2x1xf32> to vector<2x32xf32>
    %159 = arith.mulf %158, %103 : vector<2x32xf32>
    %160 = arith.addf %157, %159 : vector<2x32xf32>
    %161 = vector.broadcast %153 : vector<2x1xf32> to vector<2x32xf32>
    %162 = arith.mulf %161, %150 : vector<2x32xf32>
    %163 = vector.broadcast %155 : vector<2x1xf32> to vector<2x32xf32>
    %164 = arith.mulf %163, %108 : vector<2x32xf32>
    %165 = arith.addf %162, %164 : vector<2x32xf32>
    %166 = vector.broadcast %153 : vector<2x1xf32> to vector<2x32xf32>
    %167 = arith.mulf %166, %150 : vector<2x32xf32>
    %168 = arith.truncf %167 : vector<2x32xf32> to vector<2x32xbf16>
    %cst_39 = arith.constant dense<0.000000e+00> : vector<2x128xf32>
    %169 = tpu.matmul %168, %1, %cst_39 {dimension_numbers = #tpu.dot_dimension_numbers<[1], [0], [0], [1], [0, 0, 1, 1], [], []>} : vector<2x32xbf16>, vector<32x128xbf16>, vector<2x128xf32> -> vector<2x128xf32>
    %170 = vector.broadcast %2 : vector<1x128xf32> to vector<2x128xf32>
    %171 = arith.addf %169, %170 : vector<2x128xf32>
    %172 = arith.index_cast %c2_i32 : i32 to index
    %c0_40 = arith.constant 0 : index
    %c0_41 = arith.constant 0 : index
    %173 = vector.load %arg6[%172, %c0_40, %c0_41] : memref<8x2x128xf32, #tpu.memory_space<vmem>>, vector<1x2x128xf32>
    %174 = vector.shape_cast %173 : vector<1x2x128xf32> to vector<2x128xf32>
    %175 = vector.shape_cast %171 : vector<2x128xf32> to vector<1x2x128xf32>
    tpu.vector_store %arg6[%172, %c0_40, %c0_41], %175 {strides = array<i32>} : memref<8x2x128xf32, #tpu.memory_space<vmem>>, vector<1x2x128xf32>,
    %c3_i32 = arith.constant 3 : i32
    %176 = arith.index_cast %c3_i32 : i32 to index
    %c0_42 = arith.constant 0 : index
    %c0_43 = arith.constant 0 : index
    %177 = vector.load %arg1[%176, %c0_42, %c0_43] : memref<8x2x128xbf16, #tpu.memory_space<vmem>>, vector<1x2x128xbf16>
    %178 = vector.shape_cast %177 : vector<1x2x128xbf16> to vector<2x128xbf16>
    %179 = arith.extf %178 : vector<2x128xbf16> to vector<2x128xf32>
    %180 = arith.truncf %165 : vector<2x32xf32> to vector<2x32xbf16>
    %cst_44 = arith.constant dense<0.000000e+00> : vector<2x128xf32>
    %181 = tpu.matmul %180, %0, %cst_44 {dimension_numbers = #tpu.dot_dimension_numbers<[1], [0], [0], [1], [0, 0, 1, 1], [], []>} : vector<2x32xbf16>, vector<32x128xbf16>, vector<2x128xf32> -> vector<2x128xf32>
    %182 = arith.addf %179, %181 : vector<2x128xf32>
    %183 = vector.extract_strided_slice %182 {offsets = [0, 0], sizes = [2, 32], strides = [1, 1]} : vector<2x128xf32> to vector<2x32xf32>
    %184 = arith.negf %183 : vector<2x32xf32>
    %185 = math.exp %184 : vector<2x32xf32>
    %cst_45 = arith.constant 1.000000e+00 : f32
    %186 = vector.broadcast %cst_45 : f32 to vector<2x32xf32>
    %187 = arith.addf %186, %185 : vector<2x32xf32>
    %188 = arith.divf %186, %187 : vector<2x32xf32>
    %189 = vector.extract_strided_slice %182 {offsets = [0, 32], sizes = [2, 32], strides = [1, 1]} : vector<2x128xf32> to vector<2x32xf32>
    %190 = arith.negf %189 : vector<2x32xf32>
    %191 = math.exp %190 : vector<2x32xf32>
    %cst_46 = arith.constant 1.000000e+00 : f32
    %192 = vector.broadcast %cst_46 : f32 to vector<2x32xf32>
    %193 = arith.addf %192, %191 : vector<2x32xf32>
    %194 = arith.divf %192, %193 : vector<2x32xf32>
    %195 = vector.extract_strided_slice %182 {offsets = [0, 64], sizes = [2, 32], strides = [1, 1]} : vector<2x128xf32> to vector<2x32xf32>
    %196 = math.tanh %195 : vector<2x32xf32>
    %197 = vector.extract_strided_slice %182 {offsets = [0, 96], sizes = [2, 32], strides = [1, 1]} : vector<2x128xf32> to vector<2x32xf32>
    %198 = arith.negf %197 : vector<2x32xf32>
    %199 = math.exp %198 : vector<2x32xf32>
    %cst_47 = arith.constant 1.000000e+00 : f32
    %200 = vector.broadcast %cst_47 : f32 to vector<2x32xf32>
    %201 = arith.addf %200, %199 : vector<2x32xf32>
    %202 = arith.divf %200, %201 : vector<2x32xf32>
    %203 = arith.mulf %194, %160 : vector<2x32xf32>
    %204 = arith.mulf %188, %196 : vector<2x32xf32>
    %205 = arith.addf %203, %204 : vector<2x32xf32>
    %206 = math.tanh %205 : vector<2x32xf32>
    %207 = arith.mulf %202, %206 : vector<2x32xf32>
    %208 = arith.index_cast %c3_i32 : i32 to index
    %c0_48 = arith.constant 0 : index
    %c0_49 = arith.constant 0 : index
    %209 = vector.load %arg2[%208, %c0_48, %c0_49] : memref<8x2x1xf32, #tpu.memory_space<vmem>>, vector<1x2x1xf32>
    %210 = vector.shape_cast %209 : vector<1x2x1xf32> to vector<2x1xf32>
    %cst_50 = arith.constant 1.000000e+00 : f32
    %211 = vector.broadcast %cst_50 : f32 to vector<2x1xf32>
    %212 = arith.subf %211, %210 : vector<2x1xf32>
    %213 = vector.broadcast %210 : vector<2x1xf32> to vector<2x32xf32>
    %214 = arith.mulf %213, %205 : vector<2x32xf32>
    %215 = vector.broadcast %212 : vector<2x1xf32> to vector<2x32xf32>
    %216 = arith.mulf %215, %160 : vector<2x32xf32>
    %217 = arith.addf %214, %216 : vector<2x32xf32>
    %218 = vector.broadcast %210 : vector<2x1xf32> to vector<2x32xf32>
    %219 = arith.mulf %218, %207 : vector<2x32xf32>
    %220 = vector.broadcast %212 : vector<2x1xf32> to vector<2x32xf32>
    %221 = arith.mulf %220, %165 : vector<2x32xf32>
    %222 = arith.addf %219, %221 : vector<2x32xf32>
    %223 = vector.broadcast %210 : vector<2x1xf32> to vector<2x32xf32>
    %224 = arith.mulf %223, %207 : vector<2x32xf32>
    %225 = arith.truncf %224 : vector<2x32xf32> to vector<2x32xbf16>
    %cst_51 = arith.constant dense<0.000000e+00> : vector<2x128xf32>
    %226 = tpu.matmul %225, %1, %cst_51 {dimension_numbers = #tpu.dot_dimension_numbers<[1], [0], [0], [1], [0, 0, 1, 1], [], []>} : vector<2x32xbf16>, vector<32x128xbf16>, vector<2x128xf32> -> vector<2x128xf32>
    %227 = vector.broadcast %2 : vector<1x128xf32> to vector<2x128xf32>
    %228 = arith.addf %226, %227 : vector<2x128xf32>
    %229 = arith.index_cast %c3_i32 : i32 to index
    %c0_52 = arith.constant 0 : index
    %c0_53 = arith.constant 0 : index
    %230 = vector.load %arg6[%229, %c0_52, %c0_53] : memref<8x2x128xf32, #tpu.memory_space<vmem>>, vector<1x2x128xf32>
    %231 = vector.shape_cast %230 : vector<1x2x128xf32> to vector<2x128xf32>
    %232 = vector.shape_cast %228 : vector<2x128xf32> to vector<1x2x128xf32>
    tpu.vector_store %arg6[%229, %c0_52, %c0_53], %232 {strides = array<i32>} : memref<8x2x128xf32, #tpu.memory_space<vmem>>, vector<1x2x128xf32>,
    %c4_i32 = arith.constant 4 : i32
    %233 = arith.index_cast %c4_i32 : i32 to index
    %c0_54 = arith.constant 0 : index
    %c0_55 = arith.constant 0 : index
    %234 = vector.load %arg1[%233, %c0_54, %c0_55] : memref<8x2x128xbf16, #tpu.memory_space<vmem>>, vector<1x2x128xbf16>
    %235 = vector.shape_cast %234 : vector<1x2x128xbf16> to vector<2x128xbf16>
    %236 = arith.extf %235 : vector<2x128xbf16> to vector<2x128xf32>
    %237 = arith.truncf %222 : vector<2x32xf32> to vector<2x32xbf16>
    %cst_56 = arith.constant dense<0.000000e+00> : vector<2x128xf32>
    %238 = tpu.matmul %237, %0, %cst_56 {dimension_numbers = #tpu.dot_dimension_numbers<[1], [0], [0], [1], [0, 0, 1, 1], [], []>} : vector<2x32xbf16>, vector<32x128xbf16>, vector<2x128xf32> -> vector<2x128xf32>
    %239 = arith.addf %236, %238 : vector<2x128xf32>
    %240 = vector.extract_strided_slice %239 {offsets = [0, 0], sizes = [2, 32], strides = [1, 1]} : vector<2x128xf32> to vector<2x32xf32>
    %241 = arith.negf %240 : vector<2x32xf32>
    %242 = math.exp %241 : vector<2x32xf32>
    %cst_57 = arith.constant 1.000000e+00 : f32
    %243 = vector.broadcast %cst_57 : f32 to vector<2x32xf32>
    %244 = arith.addf %243, %242 : vector<2x32xf32>
    %245 = arith.divf %243, %244 : vector<2x32xf32>
    %246 = vector.extract_strided_slice %239 {offsets = [0, 32], sizes = [2, 32], strides = [1, 1]} : vector<2x128xf32> to vector<2x32xf32>
    %247 = arith.negf %246 : vector<2x32xf32>
    %248 = math.exp %247 : vector<2x32xf32>
    %cst_58 = arith.constant 1.000000e+00 : f32
    %249 = vector.broadcast %cst_58 : f32 to vector<2x32xf32>
    %250 = arith.addf %249, %248 : vector<2x32xf32>
    %251 = arith.divf %249, %250 : vector<2x32xf32>
    %252 = vector.extract_strided_slice %239 {offsets = [0, 64], sizes = [2, 32], strides = [1, 1]} : vector<2x128xf32> to vector<2x32xf32>
    %253 = math.tanh %252 : vector<2x32xf32>
    %254 = vector.extract_strided_slice %239 {offsets = [0, 96], sizes = [2, 32], strides = [1, 1]} : vector<2x128xf32> to vector<2x32xf32>
    %255 = arith.negf %254 : vector<2x32xf32>
    %256 = math.exp %255 : vector<2x32xf32>
    %cst_59 = arith.constant 1.000000e+00 : f32
    %257 = vector.broadcast %cst_59 : f32 to vector<2x32xf32>
    %258 = arith.addf %257, %256 : vector<2x32xf32>
    %259 = arith.divf %257, %258 : vector<2x32xf32>
    %260 = arith.mulf %251, %217 : vector<2x32xf32>
    %261 = arith.mulf %245, %253 : vector<2x32xf32>
    %262 = arith.addf %260, %261 : vector<2x32xf32>
    %263 = math.tanh %262 : vector<2x32xf32>
    %264 = arith.mulf %259, %263 : vector<2x32xf32>
    %265 = arith.index_cast %c4_i32 : i32 to index
    %c0_60 = arith.constant 0 : index
    %c0_61 = arith.constant 0 : index
    %266 = vector.load %arg2[%265, %c0_60, %c0_61] : memref<8x2x1xf32, #tpu.memory_space<vmem>>, vector<1x2x1xf32>
    %267 = vector.shape_cast %266 : vector<1x2x1xf32> to vector<2x1xf32>
    %cst_62 = arith.constant 1.000000e+00 : f32
    %268 = vector.broadcast %cst_62 : f32 to vector<2x1xf32>
    %269 = arith.subf %268, %267 : vector<2x1xf32>
    %270 = vector.broadcast %267 : vector<2x1xf32> to vector<2x32xf32>
    %271 = arith.mulf %270, %262 : vector<2x32xf32>
    %272 = vector.broadcast %269 : vector<2x1xf32> to vector<2x32xf32>
    %273 = arith.mulf %272, %217 : vector<2x32xf32>
    %274 = arith.addf %271, %273 : vector<2x32xf32>
    %275 = vector.broadcast %267 : vector<2x1xf32> to vector<2x32xf32>
    %276 = arith.mulf %275, %264 : vector<2x32xf32>
    %277 = vector.broadcast %269 : vector<2x1xf32> to vector<2x32xf32>
    %278 = arith.mulf %277, %222 : vector<2x32xf32>
    %279 = arith.addf %276, %278 : vector<2x32xf32>
    %280 = vector.broadcast %267 : vector<2x1xf32> to vector<2x32xf32>
    %281 = arith.mulf %280, %264 : vector<2x32xf32>
    %282 = arith.truncf %281 : vector<2x32xf32> to vector<2x32xbf16>
    %cst_63 = arith.constant dense<0.000000e+00> : vector<2x128xf32>
    %283 = tpu.matmul %282, %1, %cst_63 {dimension_numbers = #tpu.dot_dimension_numbers<[1], [0], [0], [1], [0, 0, 1, 1], [], []>} : vector<2x32xbf16>, vector<32x128xbf16>, vector<2x128xf32> -> vector<2x128xf32>
    %284 = vector.broadcast %2 : vector<1x128xf32> to vector<2x128xf32>
    %285 = arith.addf %283, %284 : vector<2x128xf32>
    %286 = arith.index_cast %c4_i32 : i32 to index
    %c0_64 = arith.constant 0 : index
    %c0_65 = arith.constant 0 : index
    %287 = vector.load %arg6[%286, %c0_64, %c0_65] : memref<8x2x128xf32, #tpu.memory_space<vmem>>, vector<1x2x128xf32>
    %288 = vector.shape_cast %287 : vector<1x2x128xf32> to vector<2x128xf32>
    %289 = vector.shape_cast %285 : vector<2x128xf32> to vector<1x2x128xf32>
    tpu.vector_store %arg6[%286, %c0_64, %c0_65], %289 {strides = array<i32>} : memref<8x2x128xf32, #tpu.memory_space<vmem>>, vector<1x2x128xf32>,
    %c5_i32 = arith.constant 5 : i32
    %290 = arith.index_cast %c5_i32 : i32 to index
    %c0_66 = arith.constant 0 : index
    %c0_67 = arith.constant 0 : index
    %291 = vector.load %arg1[%290, %c0_66, %c0_67] : memref<8x2x128xbf16, #tpu.memory_space<vmem>>, vector<1x2x128xbf16>
    %292 = vector.shape_cast %291 : vector<1x2x128xbf16> to vector<2x128xbf16>
    %293 = arith.extf %292 : vector<2x128xbf16> to vector<2x128xf32>
    %294 = arith.truncf %279 : vector<2x32xf32> to vector<2x32xbf16>
    %cst_68 = arith.constant dense<0.000000e+00> : vector<2x128xf32>
    %295 = tpu.matmul %294, %0, %cst_68 {dimension_numbers = #tpu.dot_dimension_numbers<[1], [0], [0], [1], [0, 0, 1, 1], [], []>} : vector<2x32xbf16>, vector<32x128xbf16>, vector<2x128xf32> -> vector<2x128xf32>
    %296 = arith.addf %293, %295 : vector<2x128xf32>
    %297 = vector.extract_strided_slice %296 {offsets = [0, 0], sizes = [2, 32], strides = [1, 1]} : vector<2x128xf32> to vector<2x32xf32>
    %298 = arith.negf %297 : vector<2x32xf32>
    %299 = math.exp %298 : vector<2x32xf32>
    %cst_69 = arith.constant 1.000000e+00 : f32
    %300 = vector.broadcast %cst_69 : f32 to vector<2x32xf32>
    %301 = arith.addf %300, %299 : vector<2x32xf32>
    %302 = arith.divf %300, %301 : vector<2x32xf32>
    %303 = vector.extract_strided_slice %296 {offsets = [0, 32], sizes = [2, 32], strides = [1, 1]} : vector<2x128xf32> to vector<2x32xf32>
    %304 = arith.negf %303 : vector<2x32xf32>
    %305 = math.exp %304 : vector<2x32xf32>
    %cst_70 = arith.constant 1.000000e+00 : f32
    %306 = vector.broadcast %cst_70 : f32 to vector<2x32xf32>
    %307 = arith.addf %306, %305 : vector<2x32xf32>
    %308 = arith.divf %306, %307 : vector<2x32xf32>
    %309 = vector.extract_strided_slice %296 {offsets = [0, 64], sizes = [2, 32], strides = [1, 1]} : vector<2x128xf32> to vector<2x32xf32>
    %310 = math.tanh %309 : vector<2x32xf32>
    %311 = vector.extract_strided_slice %296 {offsets = [0, 96], sizes = [2, 32], strides = [1, 1]} : vector<2x128xf32> to vector<2x32xf32>
    %312 = arith.negf %311 : vector<2x32xf32>
    %313 = math.exp %312 : vector<2x32xf32>
    %cst_71 = arith.constant 1.000000e+00 : f32
    %314 = vector.broadcast %cst_71 : f32 to vector<2x32xf32>
    %315 = arith.addf %314, %313 : vector<2x32xf32>
    %316 = arith.divf %314, %315 : vector<2x32xf32>
    %317 = arith.mulf %308, %274 : vector<2x32xf32>
    %318 = arith.mulf %302, %310 : vector<2x32xf32>
    %319 = arith.addf %317, %318 : vector<2x32xf32>
    %320 = math.tanh %319 : vector<2x32xf32>
    %321 = arith.mulf %316, %320 : vector<2x32xf32>
    %322 = arith.index_cast %c5_i32 : i32 to index
    %c0_72 = arith.constant 0 : index
    %c0_73 = arith.constant 0 : index
    %323 = vector.load %arg2[%322, %c0_72, %c0_73] : memref<8x2x1xf32, #tpu.memory_space<vmem>>, vector<1x2x1xf32>
    %324 = vector.shape_cast %323 : vector<1x2x1xf32> to vector<2x1xf32>
    %cst_74 = arith.constant 1.000000e+00 : f32
    %325 = vector.broadcast %cst_74 : f32 to vector<2x1xf32>
    %326 = arith.subf %325, %324 : vector<2x1xf32>
    %327 = vector.broadcast %324 : vector<2x1xf32> to vector<2x32xf32>
    %328 = arith.mulf %327, %319 : vector<2x32xf32>
    %329 = vector.broadcast %326 : vector<2x1xf32> to vector<2x32xf32>
    %330 = arith.mulf %329, %274 : vector<2x32xf32>
    %331 = arith.addf %328, %330 : vector<2x32xf32>
    %332 = vector.broadcast %324 : vector<2x1xf32> to vector<2x32xf32>
    %333 = arith.mulf %332, %321 : vector<2x32xf32>
    %334 = vector.broadcast %326 : vector<2x1xf32> to vector<2x32xf32>
    %335 = arith.mulf %334, %279 : vector<2x32xf32>
    %336 = arith.addf %333, %335 : vector<2x32xf32>
    %337 = vector.broadcast %324 : vector<2x1xf32> to vector<2x32xf32>
    %338 = arith.mulf %337, %321 : vector<2x32xf32>
    %339 = arith.truncf %338 : vector<2x32xf32> to vector<2x32xbf16>
    %cst_75 = arith.constant dense<0.000000e+00> : vector<2x128xf32>
    %340 = tpu.matmul %339, %1, %cst_75 {dimension_numbers = #tpu.dot_dimension_numbers<[1], [0], [0], [1], [0, 0, 1, 1], [], []>} : vector<2x32xbf16>, vector<32x128xbf16>, vector<2x128xf32> -> vector<2x128xf32>
    %341 = vector.broadcast %2 : vector<1x128xf32> to vector<2x128xf32>
    %342 = arith.addf %340, %341 : vector<2x128xf32>
    %343 = arith.index_cast %c5_i32 : i32 to index
    %c0_76 = arith.constant 0 : index
    %c0_77 = arith.constant 0 : index
    %344 = vector.load %arg6[%343, %c0_76, %c0_77] : memref<8x2x128xf32, #tpu.memory_space<vmem>>, vector<1x2x128xf32>
    %345 = vector.shape_cast %344 : vector<1x2x128xf32> to vector<2x128xf32>
    %346 = vector.shape_cast %342 : vector<2x128xf32> to vector<1x2x128xf32>
    tpu.vector_store %arg6[%343, %c0_76, %c0_77], %346 {strides = array<i32>} : memref<8x2x128xf32, #tpu.memory_space<vmem>>, vector<1x2x128xf32>,
    %c6_i32 = arith.constant 6 : i32
    %347 = arith.index_cast %c6_i32 : i32 to index
    %c0_78 = arith.constant 0 : index
    %c0_79 = arith.constant 0 : index
    %348 = vector.load %arg1[%347, %c0_78, %c0_79] : memref<8x2x128xbf16, #tpu.memory_space<vmem>>, vector<1x2x128xbf16>
    %349 = vector.shape_cast %348 : vector<1x2x128xbf16> to vector<2x128xbf16>
    %350 = arith.extf %349 : vector<2x128xbf16> to vector<2x128xf32>
    %351 = arith.truncf %336 : vector<2x32xf32> to vector<2x32xbf16>
    %cst_80 = arith.constant dense<0.000000e+00> : vector<2x128xf32>
    %352 = tpu.matmul %351, %0, %cst_80 {dimension_numbers = #tpu.dot_dimension_numbers<[1], [0], [0], [1], [0, 0, 1, 1], [], []>} : vector<2x32xbf16>, vector<32x128xbf16>, vector<2x128xf32> -> vector<2x128xf32>
    %353 = arith.addf %350, %352 : vector<2x128xf32>
    %354 = vector.extract_strided_slice %353 {offsets = [0, 0], sizes = [2, 32], strides = [1, 1]} : vector<2x128xf32> to vector<2x32xf32>
    %355 = arith.negf %354 : vector<2x32xf32>
    %356 = math.exp %355 : vector<2x32xf32>
    %cst_81 = arith.constant 1.000000e+00 : f32
    %357 = vector.broadcast %cst_81 : f32 to vector<2x32xf32>
    %358 = arith.addf %357, %356 : vector<2x32xf32>
    %359 = arith.divf %357, %358 : vector<2x32xf32>
    %360 = vector.extract_strided_slice %353 {offsets = [0, 32], sizes = [2, 32], strides = [1, 1]} : vector<2x128xf32> to vector<2x32xf32>
    %361 = arith.negf %360 : vector<2x32xf32>
    %362 = math.exp %361 : vector<2x32xf32>
    %cst_82 = arith.constant 1.000000e+00 : f32
    %363 = vector.broadcast %cst_82 : f32 to vector<2x32xf32>
    %364 = arith.addf %363, %362 : vector<2x32xf32>
    %365 = arith.divf %363, %364 : vector<2x32xf32>
    %366 = vector.extract_strided_slice %353 {offsets = [0, 64], sizes = [2, 32], strides = [1, 1]} : vector<2x128xf32> to vector<2x32xf32>
    %367 = math.tanh %366 : vector<2x32xf32>
    %368 = vector.extract_strided_slice %353 {offsets = [0, 96], sizes = [2, 32], strides = [1, 1]} : vector<2x128xf32> to vector<2x32xf32>
    %369 = arith.negf %368 : vector<2x32xf32>
    %370 = math.exp %369 : vector<2x32xf32>
    %cst_83 = arith.constant 1.000000e+00 : f32
    %371 = vector.broadcast %cst_83 : f32 to vector<2x32xf32>
    %372 = arith.addf %371, %370 : vector<2x32xf32>
    %373 = arith.divf %371, %372 : vector<2x32xf32>
    %374 = arith.mulf %365, %331 : vector<2x32xf32>
    %375 = arith.mulf %359, %367 : vector<2x32xf32>
    %376 = arith.addf %374, %375 : vector<2x32xf32>
    %377 = math.tanh %376 : vector<2x32xf32>
    %378 = arith.mulf %373, %377 : vector<2x32xf32>
    %379 = arith.index_cast %c6_i32 : i32 to index
    %c0_84 = arith.constant 0 : index
    %c0_85 = arith.constant 0 : index
    %380 = vector.load %arg2[%379, %c0_84, %c0_85] : memref<8x2x1xf32, #tpu.memory_space<vmem>>, vector<1x2x1xf32>
    %381 = vector.shape_cast %380 : vector<1x2x1xf32> to vector<2x1xf32>
    %cst_86 = arith.constant 1.000000e+00 : f32
    %382 = vector.broadcast %cst_86 : f32 to vector<2x1xf32>
    %383 = arith.subf %382, %381 : vector<2x1xf32>
    %384 = vector.broadcast %381 : vector<2x1xf32> to vector<2x32xf32>
    %385 = arith.mulf %384, %376 : vector<2x32xf32>
    %386 = vector.broadcast %383 : vector<2x1xf32> to vector<2x32xf32>
    %387 = arith.mulf %386, %331 : vector<2x32xf32>
    %388 = arith.addf %385, %387 : vector<2x32xf32>
    %389 = vector.broadcast %381 : vector<2x1xf32> to vector<2x32xf32>
    %390 = arith.mulf %389, %378 : vector<2x32xf32>
    %391 = vector.broadcast %383 : vector<2x1xf32> to vector<2x32xf32>
    %392 = arith.mulf %391, %336 : vector<2x32xf32>
    %393 = arith.addf %390, %392 : vector<2x32xf32>
    %394 = vector.broadcast %381 : vector<2x1xf32> to vector<2x32xf32>
    %395 = arith.mulf %394, %378 : vector<2x32xf32>
    %396 = arith.truncf %395 : vector<2x32xf32> to vector<2x32xbf16>
    %cst_87 = arith.constant dense<0.000000e+00> : vector<2x128xf32>
    %397 = tpu.matmul %396, %1, %cst_87 {dimension_numbers = #tpu.dot_dimension_numbers<[1], [0], [0], [1], [0, 0, 1, 1], [], []>} : vector<2x32xbf16>, vector<32x128xbf16>, vector<2x128xf32> -> vector<2x128xf32>
    %398 = vector.broadcast %2 : vector<1x128xf32> to vector<2x128xf32>
    %399 = arith.addf %397, %398 : vector<2x128xf32>
    %400 = arith.index_cast %c6_i32 : i32 to index
    %c0_88 = arith.constant 0 : index
    %c0_89 = arith.constant 0 : index
    %401 = vector.load %arg6[%400, %c0_88, %c0_89] : memref<8x2x128xf32, #tpu.memory_space<vmem>>, vector<1x2x128xf32>
    %402 = vector.shape_cast %401 : vector<1x2x128xf32> to vector<2x128xf32>
    %403 = vector.shape_cast %399 : vector<2x128xf32> to vector<1x2x128xf32>
    tpu.vector_store %arg6[%400, %c0_88, %c0_89], %403 {strides = array<i32>} : memref<8x2x128xf32, #tpu.memory_space<vmem>>, vector<1x2x128xf32>,
    %c7_i32 = arith.constant 7 : i32
    %404 = arith.index_cast %c7_i32 : i32 to index
    %c0_90 = arith.constant 0 : index
    %c0_91 = arith.constant 0 : index
    %405 = vector.load %arg1[%404, %c0_90, %c0_91] : memref<8x2x128xbf16, #tpu.memory_space<vmem>>, vector<1x2x128xbf16>
    %406 = vector.shape_cast %405 : vector<1x2x128xbf16> to vector<2x128xbf16>
    %407 = arith.extf %406 : vector<2x128xbf16> to vector<2x128xf32>
    %408 = arith.truncf %393 : vector<2x32xf32> to vector<2x32xbf16>
    %cst_92 = arith.constant dense<0.000000e+00> : vector<2x128xf32>
    %409 = tpu.matmul %408, %0, %cst_92 {dimension_numbers = #tpu.dot_dimension_numbers<[1], [0], [0], [1], [0, 0, 1, 1], [], []>} : vector<2x32xbf16>, vector<32x128xbf16>, vector<2x128xf32> -> vector<2x128xf32>
    %410 = arith.addf %407, %409 : vector<2x128xf32>
    %411 = vector.extract_strided_slice %410 {offsets = [0, 0], sizes = [2, 32], strides = [1, 1]} : vector<2x128xf32> to vector<2x32xf32>
    %412 = arith.negf %411 : vector<2x32xf32>
    %413 = math.exp %412 : vector<2x32xf32>
    %cst_93 = arith.constant 1.000000e+00 : f32
    %414 = vector.broadcast %cst_93 : f32 to vector<2x32xf32>
    %415 = arith.addf %414, %413 : vector<2x32xf32>
    %416 = arith.divf %414, %415 : vector<2x32xf32>
    %417 = vector.extract_strided_slice %410 {offsets = [0, 32], sizes = [2, 32], strides = [1, 1]} : vector<2x128xf32> to vector<2x32xf32>
    %418 = arith.negf %417 : vector<2x32xf32>
    %419 = math.exp %418 : vector<2x32xf32>
    %cst_94 = arith.constant 1.000000e+00 : f32
    %420 = vector.broadcast %cst_94 : f32 to vector<2x32xf32>
    %421 = arith.addf %420, %419 : vector<2x32xf32>
    %422 = arith.divf %420, %421 : vector<2x32xf32>
    %423 = vector.extract_strided_slice %410 {offsets = [0, 64], sizes = [2, 32], strides = [1, 1]} : vector<2x128xf32> to vector<2x32xf32>
    %424 = math.tanh %423 : vector<2x32xf32>
    %425 = vector.extract_strided_slice %410 {offsets = [0, 96], sizes = [2, 32], strides = [1, 1]} : vector<2x128xf32> to vector<2x32xf32>
    %426 = arith.negf %425 : vector<2x32xf32>
    %427 = math.exp %426 : vector<2x32xf32>
    %cst_95 = arith.constant 1.000000e+00 : f32
    %428 = vector.broadcast %cst_95 : f32 to vector<2x32xf32>
    %429 = arith.addf %428, %427 : vector<2x32xf32>
    %430 = arith.divf %428, %429 : vector<2x32xf32>
    %431 = arith.mulf %422, %388 : vector<2x32xf32>
    %432 = arith.mulf %416, %424 : vector<2x32xf32>
    %433 = arith.addf %431, %432 : vector<2x32xf32>
    %434 = math.tanh %433 : vector<2x32xf32>
    %435 = arith.mulf %430, %434 : vector<2x32xf32>
    %436 = arith.index_cast %c7_i32 : i32 to index
    %c0_96 = arith.constant 0 : index
    %c0_97 = arith.constant 0 : index
    %437 = vector.load %arg2[%436, %c0_96, %c0_97] : memref<8x2x1xf32, #tpu.memory_space<vmem>>, vector<1x2x1xf32>
    %438 = vector.shape_cast %437 : vector<1x2x1xf32> to vector<2x1xf32>
    %cst_98 = arith.constant 1.000000e+00 : f32
    %439 = vector.broadcast %cst_98 : f32 to vector<2x1xf32>
    %440 = arith.subf %439, %438 : vector<2x1xf32>
    %441 = vector.broadcast %438 : vector<2x1xf32> to vector<2x32xf32>
    %442 = arith.mulf %441, %433 : vector<2x32xf32>
    %443 = vector.broadcast %440 : vector<2x1xf32> to vector<2x32xf32>
    %444 = arith.mulf %443, %388 : vector<2x32xf32>
    %445 = arith.addf %442, %444 : vector<2x32xf32>
    %446 = vector.broadcast %438 : vector<2x1xf32> to vector<2x32xf32>
    %447 = arith.mulf %446, %435 : vector<2x32xf32>
    %448 = vector.broadcast %440 : vector<2x1xf32> to vector<2x32xf32>
    %449 = arith.mulf %448, %393 : vector<2x32xf32>
    %450 = arith.addf %447, %449 : vector<2x32xf32>
    %451 = vector.broadcast %438 : vector<2x1xf32> to vector<2x32xf32>
    %452 = arith.mulf %451, %435 : vector<2x32xf32>
    %453 = arith.truncf %452 : vector<2x32xf32> to vector<2x32xbf16>
    %cst_99 = arith.constant dense<0.000000e+00> : vector<2x128xf32>
    %454 = tpu.matmul %453, %1, %cst_99 {dimension_numbers = #tpu.dot_dimension_numbers<[1], [0], [0], [1], [0, 0, 1, 1], [], []>} : vector<2x32xbf16>, vector<32x128xbf16>, vector<2x128xf32> -> vector<2x128xf32>
    %455 = vector.broadcast %2 : vector<1x128xf32> to vector<2x128xf32>
    %456 = arith.addf %454, %455 : vector<2x128xf32>
    %457 = arith.index_cast %c7_i32 : i32 to index
    %c0_100 = arith.constant 0 : index
    %c0_101 = arith.constant 0 : index
    %458 = vector.load %arg6[%457, %c0_100, %c0_101] : memref<8x2x128xf32, #tpu.memory_space<vmem>>, vector<1x2x128xf32>
    %459 = vector.shape_cast %458 : vector<1x2x128xf32> to vector<2x128xf32>
    %460 = vector.shape_cast %456 : vector<2x128xf32> to vector<1x2x128xf32>
    tpu.vector_store %arg6[%457, %c0_100, %c0_101], %460 {strides = array<i32>} : memref<8x2x128xf32, #tpu.memory_space<vmem>>, vector<1x2x128xf32>,
    %c8_i32 = arith.constant 8 : i32
    return
  }
  func.func @transform_0(%arg0: i32) -> (i32, i32, i32) {
    %c0_i32 = arith.constant 0 : i32
    %c0_i32_0 = arith.constant 0 : i32
    %c0_i32_1 = arith.constant 0 : i32
    return %c0_i32, %arg0, %c0_i32_0 : i32, i32, i32
  }
  func.func @transform_1(%arg0: i32) -> (i32, i32, i32) {
    %c0_i32 = arith.constant 0 : i32
    %c0_i32_0 = arith.constant 0 : i32
    %c0_i32_1 = arith.constant 0 : i32
    return %c0_i32, %arg0, %c0_i32_0 : i32, i32, i32
  }
  func.func @transform_2(%arg0: i32) -> (i32, i32) {
    %c0_i32 = arith.constant 0 : i32
    %c0_i32_0 = arith.constant 0 : i32
    %c0_i32_1 = arith.constant 0 : i32
    return %c0_i32, %c0_i32_0 : i32, i32
  }
  func.func @transform_3(%arg0: i32) -> (i32, i32) {
    %c0_i32 = arith.constant 0 : i32
    %c0_i32_0 = arith.constant 0 : i32
    %c0_i32_1 = arith.constant 0 : i32
    return %c0_i32, %c0_i32_0 : i32, i32
  }
  func.func @transform_4(%arg0: i32) -> (i32, i32) {
    %c0_i32 = arith.constant 0 : i32
    %c0_i32_0 = arith.constant 0 : i32
    %c0_i32_1 = arith.constant 0 : i32
    return %c0_i32, %c0_i32_0 : i32, i32
  }
  func.func @transform_5(%arg0: i32) -> (i32, i32, i32) {
    %c0_i32 = arith.constant 0 : i32
    %c0_i32_0 = arith.constant 0 : i32
    %c0_i32_1 = arith.constant 0 : i32
    return %c0_i32, %arg0, %c0_i32_0 : i32, i32, i32
  }
}

</mosaic_0001>

<bundles_post_ra>
// kernel: lstm_tagger_forward.1
= control target key start
LH: loop header
LB: loop body
LE: loop exit
PB: predicated region body
PF: predicated region fallthrough
CT: control target
= control target key end

     0   :  { %v1689_v0 = vmov 0.0   ;;  %vm1690_vm0 = vmmov 0   ;;  %v1691_v2 = vmov 0   ;;  %s1692_s23 = smov 64   ;;  %s1693_s24 = smov 32   ;;  %v124_v28 = vlaneseq  ;;  %s2062_s2 = inlined_call_operand.vmem [shape: bf16[32,128], index: 2, kind: input, shape index: {}]   ;;  %s2063_s0 = inlined_call_operand.vmem [shape: bf16[8,2,128], index: 0, kind: input, shape index: {}]   ;;  %s2064_s1 = inlined_call_operand.vmem [shape: f32[8,2,1], index: 1, kind: input, shape index: {}]   ;;  %s2065_s3 = inlined_call_operand.vmem [shape: bf16[32,128], index: 3, kind: input, shape index: {}]   ;;  %s2066_s4 = inlined_call_operand.vmem [shape: f32[1,128], index: 4, kind: input, shape index: {}]   ;;  %s2067_s5 = inlined_call_operand.vmem [shape: f32[8,2,128], index: 5, kind: output, shape index: {}]  }
   0x1   :  { %1484 = vmatprep.subr.bf16.mxu0 %v1689_v0  ;;  %v1730_v1 = vld [vmem:[%s2062_s2 + $0x8] sm:$0xff]   ;;  %1488 = vmatprep.mubr.msk.bf16.mxu0 %vm1690_vm0, %v1689_v0  ;;  %v1738_v3 = vld [vmem:[%s2062_s2] sm:$0xff]   ;;  %v1694_v26 = vmov 1983009808   ;;  %vm44_vm1 = vcmask 261120  }
   0x2   :  { %1619 = vset.pattern.permute.xlu1 %v1691_v2  ;;  %1620 = vset.pattern.permute.xlu0 %v1691_v2  ;;  %v30_v4 = vld [vmem:[%s2063_s0] sm:$0x1]  ;;  %v1764_v24 = vld [vmem:[%s2065_s3 + $0x8] sm:$0xff]   ;;  %v122_v27 = vunpack.c.l.s4 %v1694_v26  ;;  %v125_v30 = vshrl.u32 %v124_v28, 7  ;;  %v1394_v48 = vld [vmem:[%s2063_s0 + $0x1] sm:$0x1] }
   0x3   :  { %1485 = vmatpush3.bf16.msra.mxu0 %v1730_v1  ;;  %1492 = vmatprep.subr.bf16.mxu1 %v1689_v0  ;;  %v31_v5 = vunpack.c.l.bf16 %v30_v4  ;;  %v113_v18 = vld [vmem:[%s2064_s1] sm:$0x3]  ;;  %v217_v50 = vunpack.c.l.bf16 %v1394_v48 }
   0x4   :  { %1486 = vmatprep.subr.bf16.mxu0 %v1689_v0  ;;  %1496 = vmatprep.mubr.msk.bf16.mxu1 %vm1690_vm0, %v1689_v0  ;;  %v114_v19 = vsub.f32 1.0, %v113_v18  ;;  %v1771_v25 = vld [vmem:[%s2065_s3] sm:$0xff]   ;;  %v123_v29 = vunpack.c.0.s8 %v122_v27  ;;  %s1695_s3 = smov 96  }
   0x5   :  { %1493 = vmatpush3.bf16.msra.mxu1 %v1764_v24  ;;  %v1807_v49 = vld [vmem:[%s2066_s4] ss:$0 sm:$0xff] }
   0x6   :  { %1494 = vmatprep.subr.bf16.mxu1 %v1689_v0  ;;  %v1775_v32 = vsub.s32 %v123_v29, %v125_v30 }
   0x7   :  { %1487 = vmatpush3.bf16.msra.mxu0 %v1738_v3 }
   0x8   :  { %1500 = vmatprep.subr.bf16.mxu0 %v1689_v0 }
   0x9   :  { %1495 = vmatpush3.bf16.msra.mxu1 %v1771_v25 }
   0xa   :  { %1489 = vmatmul.mubr.bf16.vlgmr.msra.gmra.mxu0 %v1691_v2  ;;  %1508 = vmatprep.subr.bf16.mxu1 %v1689_v0 }
   0xb   :  { %1501 = vmatpush3.bf16.msra.mxu0 %v1730_v1  ;;  %1504 = vmatprep.mubr.msk.bf16.mxu0 %vm1690_vm0, %v1689_v0 }
   0xc   :  { %1502 = vmatprep.subr.bf16.mxu0 %v1689_v0 }
   0xf   :  { %1503 = vmatpush3.bf16.msra.mxu0 %v1738_v3 }
  0x10   :  { %1516 = vmatprep.subr.bf16.mxu0 %v1689_v0 }
  0xca   :  { %v82_v6 = vpop.f32.mrf.mxu0 }
  0xcb   :  { %v88_v7 = vadd.f32 %v82_v6, %v31_v5 }
  0xcc   :  { %v1490_v8 = vpop.f32.mrf.mxu0 }
  0xcd   :  { %1625 = vtanh.f32 %v88_v7  ;;  %v1389_v12 = vmul.f32 -1.442695, %v88_v7  ;;  %v1397_v7 = vld [vmem:[%s2064_s1 + $0x2] sm:$0x3] }
  0xce   :  { %v85_v9 = vpop.f32.mrf.mxu0 }
  0xcf   :  { %1627 = vpow2.f32 %v1389_v12 }
  0xd0   :  { %v1491_v10 = vpop.f32.mrf.mxu0 }
  0xda   :  { %v1626_v11 = vpop.eup %1625 }
  0xdb   :  { %98 = vrot.lane.b32.xlu0 %v1626_v11, %s1692_s23 }
  0xdc   :  { %v1628_v13 = vpop.eup %1627 }
  0xdd   :  { %v92_v14 = vadd.f32 1.0, %v1628_v13  ;;  %v300_v13 = vsub.f32 1.0, %v1397_v7 }
  0xdf   :  { %1629 = vrcp.f32 %v92_v14 }
  0xec   :  { %v1630_v15 = vpop.eup %1629 }
  0xed   :  { %v96_v20 = vmul.f32 0.0, %v1630_v15 }
 0x14d   :  { %v99_v16 = vpop.permute.xlu0 %98 }
 0x14e   :  { %v101_v17 = vmul.f32 %v1630_v15, %v99_v16 }
 0x150   :  { %103 = vrot.lane.b32.xlu0 %v101_v17, %s1693_s24 }
 0x154   :  { %134 = vperm.xlu0 %1620, %v114_v19  }
 0x1c2   :  { %v104_v21 = vpop.permute.xlu0 %103 }
 0x1c3   :  { %v106_v22 = vadd.f32 %v104_v21, %v96_v20 }
 0x1c5   :  { %1631 = vtanh.f32 %v106_v22  ;;  %v127_v35 = vrot.slane %v106_v22, %v1775_v32 }
 0x1cf   :  { %v135_v37 = vpop.permute.xlu0 %134 }
 0x1d0   :  { %v137_v38 = vmul.f32 0.0, %v135_v37 }
 0x1d2   :  { %v1632_v23 = vpop.eup %1631 }
 0x1d3   :  { %109 = vrot.lane.b32.xlu1 %v1632_v23, %s1692_s23 }
 0x1d7   :  { %117 = vperm.xlu1 %1619, %v113_v18  }
 0x245   :  { %v110_v31 = vpop.permute.xlu1 %109 }
 0x246   :  { %v112_v33 = vmul.f32 %v1630_v15, %v110_v31 }
 0x248   :  { %v146_v34 = vrot.slane %v112_v33, %v1775_v32 }
 0x24a   :  { %147 = vrot.lane.b32.xlu1 %v146_v34, %s1693_s24  ;;  %v1400_v34 = vld [vmem:[%s2063_s0 + $0x2] sm:$0x1] }
 0x24e   :  { %128 = vrot.lane.b32.xlu1 %v127_v35, %s1695_s3  ;;  %v387_v35 = vunpack.c.l.bf16 %v1400_v34 }
 0x252   :  { %v118_v36 = vpop.permute.xlu1 %117 }
 0x2bc   :  { %v148_v39 = vpop.permute.xlu1 %147 }
 0x2bd   :  { %v150_v40 = vmul.f32 %v148_v39, %v118_v36 }
 0x2bf   :  { %v1781_v41 = vadd.f32 %v150_v40, %v137_v38  ;;  %v152_v42 = vpack.c.bf16 %v150_v40, %v150_v40 }
 0x2c0   :  { %v129_v43 = vpop.permute.xlu1 %128 }
 0x2c1   :  { %v218_v44 = vpack.c.bf16 %v1781_v41, %v1781_v41  ;;  %v131_v45 = vmul.f32 %v129_v43, %v118_v36  ;;  %1497 = vmatmul.mubr.msk.bf16.vlgmr.msra.gmra.mxu1 %vm44_vm1, %v152_v42 }
 0x2c2   :  { %1509 = vmatpush3.bf16.msra.mxu1 %v1764_v24  ;;  %1512 = vmatprep.mubr.msk.bf16.mxu1 %vm1690_vm0, %v1689_v0 }
 0x2c3   :  { %v138_v46 = vadd.f32 %v137_v38, %v131_v45  ;;  %1505 = vmatmul.mubr.msk.bf16.vlgmr.msra.gmra.mxu0 %vm44_vm1, %v218_v44  ;;  %1510 = vmatprep.subr.bf16.mxu1 %v1689_v0 }
 0x2c4   :  { %1517 = vmatpush3.bf16.msra.mxu0 %v1730_v1  ;;  %1520 = vmatprep.mubr.msk.bf16.mxu0 %vm1690_vm0, %v1689_v0 }
 0x2c5   :  { %v277_v47 = vrot.slane %v138_v46, %v1775_v32  ;;  %1518 = vmatprep.subr.bf16.mxu0 %v1689_v0 }
 0x2c6   :  { %1511 = vmatpush3.bf16.msra.mxu1 %v1771_v25 }
 0x2c7   :  { %278 = vrot.lane.b32.xlu1 %v277_v47, %s1693_s24  ;;  %1524 = vmatprep.subr.bf16.mxu1 %v1689_v0 }
 0x2c8   :  { %1519 = vmatpush3.bf16.msra.mxu0 %v1738_v3 }
 0x2c9   :  { %1532 = vmatprep.subr.bf16.mxu0 %v1689_v0 }
 0x339   :  { %v279_v8 = vpop.permute.xlu1 %278 }
 0x381   :  { %v208_v51 = vpop.f32.mrf.mxu1 }
 0x382   :  { %v209_v52 = vadd.f32 %v1807_v49, %v208_v51 }
 0x383   :  { %v1498_v53 = vpop.f32.mrf.mxu1  ;;  %v256_v54 = vpop.f32.mrf.mxu0 }
 0x384   :  { %214 = vst [vmem:[%s2067_s5] sm:$0x3] %v209_v52  ;;  %v262_v55 = vadd.f32 %v256_v54, %v217_v50  ;;  %v1403_v54 = vld [vmem:[%s2064_s1 + $0x4] sm:$0x3] }
 0x385   :  { %v211_v56 = vpop.f32.mrf.mxu1  ;;  %v1506_v57 = vpop.f32.mrf.mxu0 }
 0x386   :  { %1633 = vtanh.f32 %v262_v55  ;;  %v1396_v62 = vmul.f32 -1.442695, %v262_v55 }
 0x387   :  { %v1499_v58 = vpop.f32.mrf.mxu1  ;;  %v259_v59 = vpop.f32.mrf.mxu0 }
 0x388   :  { %1635 = vpow2.f32 %v1396_v62 }
 0x389   :  { %v1507_v60 = vpop.f32.mrf.mxu0 }
 0x38a   :  { %v470_v60 = vsub.f32 1.0, %v1403_v54 }
 0x393   :  { %v1634_v61 = vpop.eup %1633 }
 0x394   :  { %283 = vrot.lane.b32.xlu0 %v1634_v61, %s1692_s23 }
 0x395   :  { %v1636_v63 = vpop.eup %1635 }
 0x396   :  { %v266_v2 = vadd.f32 1.0, %v1636_v63 }
 0x398   :  { %1637 = vrcp.f32 %v266_v2 }
 0x3a5   :  { %v1638_v4 = vpop.eup %1637 }
 0x3a6   :  { %v281_v9 = vmul.f32 %v1638_v4, %v279_v8 }
 0x406   :  { %v284_v5 = vpop.permute.xlu0 %283 }
 0x407   :  { %v286_v6 = vmul.f32 %v1638_v4, %v284_v5 }
 0x409   :  { %288 = vrot.lane.b32.xlu0 %v286_v6, %s1693_s24 }
 0x40d   :  { %303 = vperm.xlu0 %1620, %v1397_v7  }
 0x47b   :  { %v289_v10 = vpop.permute.xlu0 %288 }
 0x47c   :  { %v291_v11 = vadd.f32 %v289_v10, %v281_v9 }
 0x47e   :  { %1639 = vtanh.f32 %v291_v11  ;;  %v313_v14 = vrot.slane %v291_v11, %v1775_v32 }
 0x488   :  { %v304_v19 = vpop.permute.xlu0 %303 }
 0x48b   :  { %v1640_v12 = vpop.eup %1639 }
 0x48c   :  { %294 = vrot.lane.b32.xlu1 %v1640_v12, %s1692_s23 }
 0x490   :  { %320 = vperm.xlu1 %1619, %v300_v13  }
 0x494   :  { %314 = vrot.lane.b32.xlu1 %v313_v14, %s1695_s3 }
 0x4fe   :  { %v295_v15 = vpop.permute.xlu1 %294 }
 0x4ff   :  { %v297_v16 = vmul.f32 %v1638_v4, %v295_v15 }
 0x501   :  { %v332_v17 = vrot.slane %v297_v16, %v1775_v32 }
 0x503   :  { %333 = vrot.lane.b32.xlu0 %v332_v17, %s1693_s24  ;;  %v1406_v17 = vld [vmem:[%s2063_s0 + $0x3] sm:$0x1] }
 0x50b   :  { %v321_v18 = vpop.permute.xlu1 %320 }
 0x50c   :  { %v323_v21 = vmul.f32 %v321_v18, %v138_v46  ;;  %v337_v28 = vmul.f32 %v321_v18, %v1781_v41  ;;  %v557_v18 = vunpack.c.l.bf16 %v1406_v17 }
 0x50f   :  { %v315_v20 = vpop.permute.xlu1 %314 }
 0x510   :  { %v317_v22 = vmul.f32 %v315_v20, %v304_v19 }
 0x512   :  { %v1823_v23 = vadd.f32 %v323_v21, %v317_v22 }
 0x514   :  { %v447_v26 = vrot.slane %v1823_v23, %v1775_v32 }
 0x516   :  { %448 = vrot.lane.b32.xlu1 %v447_v26, %s1693_s24 }
 0x575   :  { %v334_v27 = vpop.permute.xlu0 %333 }
 0x576   :  { %v336_v29 = vmul.f32 %v334_v27, %v304_v19 }
 0x578   :  { %v1829_v30 = vadd.f32 %v337_v28, %v336_v29  ;;  %v339_v31 = vpack.c.bf16 %v336_v29, %v336_v29 }
 0x57a   :  { %v388_v33 = vpack.c.bf16 %v1829_v30, %v1829_v30  ;;  %1513 = vmatmul.mubr.msk.bf16.vlgmr.msra.gmra.mxu1 %vm44_vm1, %v339_v31 }
 0x57b   :  { %1525 = vmatpush3.bf16.msra.mxu1 %v1764_v24  ;;  %1528 = vmatprep.mubr.msk.bf16.mxu1 %vm1690_vm0, %v1689_v0 }
 0x57c   :  { %1521 = vmatmul.mubr.msk.bf16.vlgmr.msra.gmra.mxu0 %vm44_vm1, %v388_v33  ;;  %1526 = vmatprep.subr.bf16.mxu1 %v1689_v0 }
 0x57d   :  { %1533 = vmatpush3.bf16.msra.mxu0 %v1730_v1  ;;  %1536 = vmatprep.mubr.msk.bf16.mxu0 %vm1690_vm0, %v1689_v0 }
 0x57e   :  { %1534 = vmatprep.subr.bf16.mxu0 %v1689_v0 }
 0x57f   :  { %1527 = vmatpush3.bf16.msra.mxu1 %v1771_v25 }
 0x580   :  { %1540 = vmatprep.subr.bf16.mxu1 %v1689_v0 }
 0x581   :  { %1535 = vmatpush3.bf16.msra.mxu0 %v1738_v3 }
 0x582   :  { %1548 = vmatprep.subr.bf16.mxu0 %v1689_v0 }
 0x588   :  { %v449_v55 = vpop.permute.xlu1 %448 }
 0x63a   :  { %v377_v36 = vpop.f32.mrf.mxu1 }
 0x63b   :  { %v378_v37 = vadd.f32 %v1807_v49, %v377_v36 }
 0x63c   :  { %v1514_v38 = vpop.f32.mrf.mxu1  ;;  %v426_v39 = vpop.f32.mrf.mxu0 }
 0x63d   :  { %1399 = vst [vmem:[%s2067_s5 + $0x2] sm:$0x3] %v378_v37  ;;  %v432_v40 = vadd.f32 %v426_v39, %v387_v35  ;;  %v1409_v39 = vld [vmem:[%s2064_s1 + $0x6] sm:$0x3] }
 0x63e   :  { %v380_v41 = vpop.f32.mrf.mxu1  ;;  %v1522_v42 = vpop.f32.mrf.mxu0 }
 0x63f   :  { %1641 = vtanh.f32 %v432_v40  ;;  %v1402_v47 = vmul.f32 -1.442695, %v432_v40 }
 0x640   :  { %v1515_v43 = vpop.f32.mrf.mxu1  ;;  %v429_v44 = vpop.f32.mrf.mxu0 }
 0x641   :  { %1643 = vpow2.f32 %v1402_v47 }
 0x642   :  { %v1523_v45 = vpop.f32.mrf.mxu0 }
 0x643   :  { %v640_v45 = vsub.f32 1.0, %v1409_v39 }
 0x64c   :  { %v1642_v46 = vpop.eup %1641 }
 0x64d   :  { %453 = vrot.lane.b32.xlu0 %v1642_v46, %s1692_s23 }
 0x64e   :  { %v1644_v48 = vpop.eup %1643 }
 0x64f   :  { %v436_v50 = vadd.f32 1.0, %v1644_v48 }
 0x651   :  { %1645 = vrcp.f32 %v436_v50 }
 0x65e   :  { %v1646_v51 = vpop.eup %1645 }
 0x65f   :  { %v451_v56 = vmul.f32 %v1646_v51, %v449_v55 }
 0x6bf   :  { %v454_v52 = vpop.permute.xlu0 %453 }
 0x6c0   :  { %v456_v53 = vmul.f32 %v1646_v51, %v454_v52 }
 0x6c2   :  { %458 = vrot.lane.b32.xlu0 %v456_v53, %s1693_s24 }
 0x6c6   :  { %473 = vperm.xlu0 %1620, %v1403_v54  }
 0x734   :  { %v459_v57 = vpop.permute.xlu0 %458 }
 0x735   :  { %v461_v58 = vadd.f32 %v459_v57, %v451_v56 }
 0x737   :  { %1647 = vtanh.f32 %v461_v58  ;;  %v483_v61 = vrot.slane %v461_v58, %v1775_v32 }
 0x741   :  { %v474_v5 = vpop.permute.xlu0 %473 }
 0x744   :  { %v1648_v59 = vpop.eup %1647 }
 0x745   :  { %464 = vrot.lane.b32.xlu1 %v1648_v59, %s1692_s23 }
 0x749   :  { %490 = vperm.xlu1 %1619, %v470_v60  }
 0x74d   :  { %484 = vrot.lane.b32.xlu1 %v483_v61, %s1695_s3 }
 0x7b7   :  { %v465_v62 = vpop.permute.xlu1 %464 }
 0x7b8   :  { %v467_v63 = vmul.f32 %v1646_v51, %v465_v62 }
 0x7ba   :  { %v502_v2 = vrot.slane %v467_v63, %v1775_v32 }
 0x7bc   :  { %503 = vrot.lane.b32.xlu0 %v502_v2, %s1693_s24  ;;  %v1412_v2 = vld [vmem:[%s2063_s0 + $0x4] sm:$0x1] }
 0x7c4   :  { %v491_v4 = vpop.permute.xlu1 %490 }
 0x7c5   :  { %v493_v7 = vmul.f32 %v491_v4, %v1823_v23  ;;  %v507_v12 = vmul.f32 %v491_v4, %v1829_v30  ;;  %v727_v4 = vunpack.c.l.bf16 %v1412_v2 }
 0x7c8   :  { %v485_v6 = vpop.permute.xlu1 %484 }
 0x7c9   :  { %v487_v8 = vmul.f32 %v485_v6, %v474_v5 }
 0x7cb   :  { %v1865_v9 = vadd.f32 %v493_v7, %v487_v8 }
 0x7cd   :  { %v617_v10 = vrot.slane %v1865_v9, %v1775_v32 }
 0x7cf   :  { %618 = vrot.lane.b32.xlu1 %v617_v10, %s1693_s24 }
 0x82e   :  { %v504_v11 = vpop.permute.xlu0 %503 }
 0x82f   :  { %v506_v13 = vmul.f32 %v504_v11, %v474_v5 }
 0x831   :  { %v1871_v14 = vadd.f32 %v507_v12, %v506_v13  ;;  %v509_v15 = vpack.c.bf16 %v506_v13, %v506_v13 }
 0x833   :  { %v558_v16 = vpack.c.bf16 %v1871_v14, %v1871_v14  ;;  %1529 = vmatmul.mubr.msk.bf16.vlgmr.msra.gmra.mxu1 %vm44_vm1, %v509_v15 }
 0x834   :  { %1541 = vmatpush3.bf16.msra.mxu1 %v1764_v24  ;;  %1544 = vmatprep.mubr.msk.bf16.mxu1 %vm1690_vm0, %v1689_v0 }
 0x835   :  { %1537 = vmatmul.mubr.msk.bf16.vlgmr.msra.gmra.mxu0 %vm44_vm1, %v558_v16  ;;  %1542 = vmatprep.subr.bf16.mxu1 %v1689_v0 }
 0x836   :  { %1549 = vmatpush3.bf16.msra.mxu0 %v1730_v1  ;;  %1552 = vmatprep.mubr.msk.bf16.mxu0 %vm1690_vm0, %v1689_v0 }
 0x837   :  { %1550 = vmatprep.subr.bf16.mxu0 %v1689_v0 }
 0x838   :  { %1543 = vmatpush3.bf16.msra.mxu1 %v1771_v25 }
 0x839   :  { %1556 = vmatprep.subr.bf16.mxu1 %v1689_v0 }
 0x83a   :  { %1551 = vmatpush3.bf16.msra.mxu0 %v1738_v3 }
 0x83b   :  { %1564 = vmatprep.subr.bf16.mxu0 %v1689_v0 }
 0x841   :  { %v619_v40 = vpop.permute.xlu1 %618 }
 0x8f3   :  { %v547_v19 = vpop.f32.mrf.mxu1 }
 0x8f4   :  { %v548_v20 = vadd.f32 %v1807_v49, %v547_v19 }
 0x8f5   :  { %v1530_v21 = vpop.f32.mrf.mxu1  ;;  %v596_v22 = vpop.f32.mrf.mxu0 }
 0x8f6   :  { %1405 = vst [vmem:[%s2067_s5 + $0x4] sm:$0x3] %v548_v20  ;;  %v602_v23 = vadd.f32 %v596_v22, %v557_v18  ;;  %v1415_v22 = vld [vmem:[%s2064_s1 + $0x8] sm:$0x3] }
 0x8f7   :  { %v550_v26 = vpop.f32.mrf.mxu1  ;;  %v1538_v27 = vpop.f32.mrf.mxu0 }
 0x8f8   :  { %1649 = vtanh.f32 %v602_v23  ;;  %v1408_v33 = vmul.f32 -1.442695, %v602_v23 }
 0x8f9   :  { %v1531_v28 = vpop.f32.mrf.mxu1  ;;  %v599_v29 = vpop.f32.mrf.mxu0 }
 0x8fa   :  { %1651 = vpow2.f32 %v1408_v33 }
 0x8fb   :  { %v1539_v30 = vpop.f32.mrf.mxu0 }
 0x8fc   :  { %v810_v30 = vsub.f32 1.0, %v1415_v22 }
 0x905   :  { %v1650_v31 = vpop.eup %1649 }
 0x906   :  { %623 = vrot.lane.b32.xlu0 %v1650_v31, %s1692_s23 }
 0x907   :  { %v1652_v34 = vpop.eup %1651 }
 0x908   :  { %v606_v35 = vadd.f32 1.0, %v1652_v34 }
 0x90a   :  { %1653 = vrcp.f32 %v606_v35 }
 0x917   :  { %v1654_v36 = vpop.eup %1653 }
 0x918   :  { %v621_v41 = vmul.f32 %v1654_v36, %v619_v40 }
 0x978   :  { %v624_v37 = vpop.permute.xlu0 %623 }
 0x979   :  { %v626_v38 = vmul.f32 %v1654_v36, %v624_v37 }
 0x97b   :  { %628 = vrot.lane.b32.xlu0 %v626_v38, %s1693_s24 }
 0x97f   :  { %643 = vperm.xlu0 %1620, %v1409_v39  }
 0x9ed   :  { %v629_v42 = vpop.permute.xlu0 %628 }
 0x9ee   :  { %v631_v43 = vadd.f32 %v629_v42, %v621_v41 }
 0x9f0   :  { %1655 = vtanh.f32 %v631_v43  ;;  %v653_v46 = vrot.slane %v631_v43, %v1775_v32 }
 0x9fa   :  { %v644_v52 = vpop.permute.xlu0 %643 }
 0x9fd   :  { %v1656_v44 = vpop.eup %1655 }
 0x9fe   :  { %634 = vrot.lane.b32.xlu1 %v1656_v44, %s1692_s23 }
 0xa02   :  { %660 = vperm.xlu1 %1619, %v640_v45  }
 0xa06   :  { %654 = vrot.lane.b32.xlu1 %v653_v46, %s1695_s3 }
 0xa70   :  { %v635_v47 = vpop.permute.xlu1 %634 }
 0xa71   :  { %v637_v48 = vmul.f32 %v1654_v36, %v635_v47 }
 0xa73   :  { %v672_v50 = vrot.slane %v637_v48, %v1775_v32 }
 0xa75   :  { %673 = vrot.lane.b32.xlu0 %v672_v50, %s1693_s24  ;;  %v1418_v50 = vld [vmem:[%s2063_s0 + $0x5] sm:$0x1] }
 0xa7d   :  { %v661_v51 = vpop.permute.xlu1 %660 }
 0xa7e   :  { %v663_v54 = vmul.f32 %v661_v51, %v1865_v9  ;;  %v677_v59 = vmul.f32 %v661_v51, %v1871_v14  ;;  %v897_v51 = vunpack.c.l.bf16 %v1418_v50 }
 0xa81   :  { %v655_v53 = vpop.permute.xlu1 %654 }
 0xa82   :  { %v657_v55 = vmul.f32 %v655_v53, %v644_v52 }
 0xa84   :  { %v1907_v56 = vadd.f32 %v663_v54, %v657_v55 }
 0xa86   :  { %v787_v57 = vrot.slane %v1907_v56, %v1775_v32 }
 0xa88   :  { %788 = vrot.lane.b32.xlu1 %v787_v57, %s1693_s24 }
 0xae7   :  { %v674_v58 = vpop.permute.xlu0 %673 }
 0xae8   :  { %v676_v60 = vmul.f32 %v674_v58, %v644_v52 }
 0xaea   :  { %v1913_v61 = vadd.f32 %v677_v59, %v676_v60  ;;  %v679_v62 = vpack.c.bf16 %v676_v60, %v676_v60 }
 0xaec   :  { %v728_v63 = vpack.c.bf16 %v1913_v61, %v1913_v61  ;;  %1545 = vmatmul.mubr.msk.bf16.vlgmr.msra.gmra.mxu1 %vm44_vm1, %v679_v62 }
 0xaed   :  { %1557 = vmatpush3.bf16.msra.mxu1 %v1764_v24  ;;  %1560 = vmatprep.mubr.msk.bf16.mxu1 %vm1690_vm0, %v1689_v0 }
 0xaee   :  { %1553 = vmatmul.mubr.msk.bf16.vlgmr.msra.gmra.mxu0 %vm44_vm1, %v728_v63  ;;  %1558 = vmatprep.subr.bf16.mxu1 %v1689_v0 }
 0xaef   :  { %1565 = vmatpush3.bf16.msra.mxu0 %v1730_v1  ;;  %1568 = vmatprep.mubr.msk.bf16.mxu0 %vm1690_vm0, %v1689_v0 }
 0xaf0   :  { %1566 = vmatprep.subr.bf16.mxu0 %v1689_v0 }
 0xaf1   :  { %1559 = vmatpush3.bf16.msra.mxu1 %v1771_v25 }
 0xaf2   :  { %1572 = vmatprep.subr.bf16.mxu1 %v1689_v0 }
 0xaf3   :  { %1567 = vmatpush3.bf16.msra.mxu0 %v1738_v3 }
 0xaf4   :  { %1580 = vmatprep.subr.bf16.mxu0 %v1689_v0 }
 0xafa   :  { %v789_v23 = vpop.permute.xlu1 %788 }
 0xbac   :  { %v717_v5 = vpop.f32.mrf.mxu1 }
 0xbad   :  { %v718_v6 = vadd.f32 %v1807_v49, %v717_v5 }
 0xbae   :  { %v1546_v7 = vpop.f32.mrf.mxu1  ;;  %v766_v8 = vpop.f32.mrf.mxu0 }
 0xbaf   :  { %1411 = vst [vmem:[%s2067_s5 + $0x6] sm:$0x3] %v718_v6  ;;  %v772_v9 = vadd.f32 %v766_v8, %v727_v4  ;;  %v1421_v8 = vld [vmem:[%s2064_s1 + $0xa] sm:$0x3] }
 0xbb0   :  { %v720_v10 = vpop.f32.mrf.mxu1  ;;  %v1554_v11 = vpop.f32.mrf.mxu0 }
 0xbb1   :  { %1657 = vtanh.f32 %v772_v9  ;;  %v1414_v16 = vmul.f32 -1.442695, %v772_v9 }
 0xbb2   :  { %v1547_v12 = vpop.f32.mrf.mxu1  ;;  %v769_v13 = vpop.f32.mrf.mxu0 }
 0xbb3   :  { %1659 = vpow2.f32 %v1414_v16 }
 0xbb4   :  { %v1555_v14 = vpop.f32.mrf.mxu0 }
 0xbb5   :  { %v980_v14 = vsub.f32 1.0, %v1421_v8 }
 0xbbe   :  { %v1658_v15 = vpop.eup %1657 }
 0xbbf   :  { %793 = vrot.lane.b32.xlu0 %v1658_v15, %s1692_s23 }
 0xbc0   :  { %v1660_v17 = vpop.eup %1659 }
 0xbc1   :  { %v776_v18 = vadd.f32 1.0, %v1660_v17 }
 0xbc3   :  { %1661 = vrcp.f32 %v776_v18 }
 0xbd0   :  { %v1662_v19 = vpop.eup %1661 }
 0xbd1   :  { %v791_v26 = vmul.f32 %v1662_v19, %v789_v23 }
 0xc31   :  { %v794_v20 = vpop.permute.xlu0 %793 }
 0xc32   :  { %v796_v21 = vmul.f32 %v1662_v19, %v794_v20 }
 0xc34   :  { %798 = vrot.lane.b32.xlu0 %v796_v21, %s1693_s24 }
 0xc38   :  { %813 = vperm.xlu0 %1620, %v1415_v22  }
 0xca6   :  { %v799_v27 = vpop.permute.xlu0 %798 }
 0xca7   :  { %v801_v28 = vadd.f32 %v799_v27, %v791_v26 }
 0xca9   :  { %1663 = vtanh.f32 %v801_v28  ;;  %v823_v31 = vrot.slane %v801_v28, %v1775_v32 }
 0xcb3   :  { %v814_v37 = vpop.permute.xlu0 %813 }
 0xcb6   :  { %v1664_v29 = vpop.eup %1663 }
 0xcb7   :  { %804 = vrot.lane.b32.xlu1 %v1664_v29, %s1692_s23 }
 0xcbb   :  { %830 = vperm.xlu1 %1619, %v810_v30  }
 0xcbf   :  { %824 = vrot.lane.b32.xlu1 %v823_v31, %s1695_s3 }
 0xd29   :  { %v805_v33 = vpop.permute.xlu1 %804 }
 0xd2a   :  { %v807_v34 = vmul.f32 %v1662_v19, %v805_v33 }
 0xd2c   :  { %v842_v35 = vrot.slane %v807_v34, %v1775_v32 }
 0xd2e   :  { %843 = vrot.lane.b32.xlu0 %v842_v35, %s1693_s24  ;;  %v1424_v35 = vld [vmem:[%s2063_s0 + $0x6] sm:$0x1] }
 0xd36   :  { %v831_v36 = vpop.permute.xlu1 %830 }
 0xd37   :  { %v833_v39 = vmul.f32 %v831_v36, %v1907_v56  ;;  %v847_v44 = vmul.f32 %v831_v36, %v1913_v61  ;;  %v1067_v36 = vunpack.c.l.bf16 %v1424_v35  ;;  %v1433_v35 = vld [vmem:[%s2064_s1 + $0xe] sm:$0x3] }
 0xd3a   :  { %v825_v38 = vpop.permute.xlu1 %824 }
 0xd3b   :  { %v827_v40 = vmul.f32 %v825_v38, %v814_v37 }
 0xd3d   :  { %v1949_v41 = vadd.f32 %v833_v39, %v827_v40 }
 0xd3f   :  { %v957_v42 = vrot.slane %v1949_v41, %v1775_v32 }
 0xd41   :  { %958 = vrot.lane.b32.xlu1 %v957_v42, %s1693_s24 }
 0xda0   :  { %v844_v43 = vpop.permute.xlu0 %843 }
 0xda1   :  { %v846_v45 = vmul.f32 %v844_v43, %v814_v37 }
 0xda3   :  { %v1955_v46 = vadd.f32 %v847_v44, %v846_v45  ;;  %v849_v47 = vpack.c.bf16 %v846_v45, %v846_v45 }
 0xda5   :  { %v898_v48 = vpack.c.bf16 %v1955_v46, %v1955_v46  ;;  %1561 = vmatmul.mubr.msk.bf16.vlgmr.msra.gmra.mxu1 %vm44_vm1, %v849_v47 }
 0xda6   :  { %1573 = vmatpush3.bf16.msra.mxu1 %v1764_v24  ;;  %1576 = vmatprep.mubr.msk.bf16.mxu1 %vm1690_vm0, %v1689_v0 }
 0xda7   :  { %1569 = vmatmul.mubr.msk.bf16.vlgmr.msra.gmra.mxu0 %vm44_vm1, %v898_v48  ;;  %1574 = vmatprep.subr.bf16.mxu1 %v1689_v0 }
 0xda8   :  { %1581 = vmatpush3.bf16.msra.mxu0 %v1730_v1  ;;  %1584 = vmatprep.mubr.msk.bf16.mxu0 %vm1690_vm0, %v1689_v0 }
 0xda9   :  { %1582 = vmatprep.subr.bf16.mxu0 %v1689_v0 }
 0xdaa   :  { %1575 = vmatpush3.bf16.msra.mxu1 %v1771_v25 }
 0xdab   :  { %1588 = vmatprep.subr.bf16.mxu1 %v1689_v0 }
 0xdac   :  { %1583 = vmatpush3.bf16.msra.mxu0 %v1738_v3 }
 0xdad   :  { %1596 = vmatprep.subr.bf16.mxu0 %v1689_v0 }
 0xdb3   :  { %v959_v9 = vpop.permute.xlu1 %958 }
 0xe65   :  { %v887_v52 = vpop.f32.mrf.mxu1 }
 0xe66   :  { %v888_v53 = vadd.f32 %v1807_v49, %v887_v52 }
 0xe67   :  { %v1562_v54 = vpop.f32.mrf.mxu1  ;;  %v936_v55 = vpop.f32.mrf.mxu0 }
 0xe68   :  { %1417 = vst [vmem:[%s2067_s5 + $0x8] sm:$0x3] %v888_v53  ;;  %v942_v56 = vadd.f32 %v936_v55, %v897_v51  ;;  %v1427_v53 = vld [vmem:[%s2064_s1 + $0xc] sm:$0x3] }
 0xe69   :  { %v890_v57 = vpop.f32.mrf.mxu1  ;;  %v1570_v58 = vpop.f32.mrf.mxu0 }
 0xe6a   :  { %1665 = vtanh.f32 %v942_v56  ;;  %v1420_v63 = vmul.f32 -1.442695, %v942_v56 }
 0xe6b   :  { %v1563_v59 = vpop.f32.mrf.mxu1  ;;  %v939_v60 = vpop.f32.mrf.mxu0 }
 0xe6c   :  { %1667 = vpow2.f32 %v1420_v63  ;;  %v1150_v59 = vsub.f32 1.0, %v1427_v53 }
 0xe6d   :  { %v1571_v61 = vpop.f32.mrf.mxu0 }
 0xe77   :  { %v1666_v62 = vpop.eup %1665 }
 0xe78   :  { %963 = vrot.lane.b32.xlu0 %v1666_v62, %s1692_s23 }
 0xe79   :  { %v1668_v2 = vpop.eup %1667 }
 0xe7a   :  { %v946_v4 = vadd.f32 1.0, %v1668_v2 }
 0xe7c   :  { %1669 = vrcp.f32 %v946_v4 }
 0xe89   :  { %v1670_v5 = vpop.eup %1669 }
 0xe8a   :  { %v961_v10 = vmul.f32 %v1670_v5, %v959_v9 }
 0xeea   :  { %v964_v6 = vpop.permute.xlu0 %963 }
 0xeeb   :  { %v966_v7 = vmul.f32 %v1670_v5, %v964_v6 }
 0xeed   :  { %968 = vrot.lane.b32.xlu0 %v966_v7, %s1693_s24 }
 0xef1   :  { %983 = vperm.xlu0 %1620, %v1421_v8  }
 0xf5f   :  { %v969_v11 = vpop.permute.xlu0 %968 }
 0xf60   :  { %v971_v12 = vadd.f32 %v969_v11, %v961_v10 }
 0xf62   :  { %1671 = vtanh.f32 %v971_v12  ;;  %v993_v15 = vrot.slane %v971_v12, %v1775_v32 }
 0xf6c   :  { %v984_v20 = vpop.permute.xlu0 %983 }
 0xf6f   :  { %v1672_v13 = vpop.eup %1671 }
 0xf70   :  { %974 = vrot.lane.b32.xlu1 %v1672_v13, %s1692_s23 }
 0xf74   :  { %1000 = vperm.xlu1 %1619, %v980_v14  }
 0xf78   :  { %994 = vrot.lane.b32.xlu1 %v993_v15, %s1695_s3 }
 0xfe2   :  { %v975_v16 = vpop.permute.xlu1 %974 }
 0xfe3   :  { %v977_v17 = vmul.f32 %v1670_v5, %v975_v16  ;;  %v1430_v16 = vld [vmem:[%s2063_s0 + $0x7] sm:$0x1] }
 0xfe5   :  { %v1012_v18 = vrot.slane %v977_v17, %v1775_v32  ;;  %v1237_v17 = vunpack.c.l.bf16 %v1430_v16 }
 0xfe7   :  { %1013 = vrot.lane.b32.xlu0 %v1012_v18, %s1693_s24 }
 0xfef   :  { %v1001_v19 = vpop.permute.xlu1 %1000 }
 0xff0   :  { %v1003_v22 = vmul.f32 %v1001_v19, %v1949_v41  ;;  %v1017_v29 = vmul.f32 %v1001_v19, %v1955_v46 }
 0xff3   :  { %v995_v21 = vpop.permute.xlu1 %994 }
 0xff4   :  { %v997_v23 = vmul.f32 %v995_v21, %v984_v20 }
 0xff6   :  { %v1991_v26 = vadd.f32 %v1003_v22, %v997_v23 }
 0xff8   :  { %v1127_v27 = vrot.slane %v1991_v26, %v1775_v32 }
 0xffa   :  { %1128 = vrot.lane.b32.xlu1 %v1127_v27, %s1693_s24 }
0x1059   :  { %v1014_v28 = vpop.permute.xlu0 %1013 }
0x105a   :  { %v1016_v30 = vmul.f32 %v1014_v28, %v984_v20 }
0x105c   :  { %v1997_v31 = vadd.f32 %v1017_v29, %v1016_v30  ;;  %v1019_v33 = vpack.c.bf16 %v1016_v30, %v1016_v30 }
0x105e   :  { %v1068_v34 = vpack.c.bf16 %v1997_v31, %v1997_v31  ;;  %1577 = vmatmul.mubr.msk.bf16.vlgmr.msra.gmra.mxu1 %vm44_vm1, %v1019_v33 }
0x105f   :  { %1589 = vmatpush3.bf16.msra.mxu1 %v1764_v24  ;;  %1592 = vmatprep.mubr.msk.bf16.mxu1 %vm1690_vm0, %v1689_v0 }
0x1060   :  { %1585 = vmatmul.mubr.msk.bf16.vlgmr.msra.gmra.mxu0 %vm44_vm1, %v1068_v34  ;;  %1590 = vmatprep.subr.bf16.mxu1 %v1689_v0 }
0x1061   :  { %1597 = vmatpush3.bf16.msra.mxu0 %v1730_v1  ;;  %1600 = vmatprep.mubr.msk.bf16.mxu0 %vm1690_vm0, %v1689_v0 }
0x1062   :  { %1598 = vmatprep.subr.bf16.mxu0 %v1689_v0 }
0x1063   :  { %1591 = vmatpush3.bf16.msra.mxu1 %v1771_v25 }
0x1064   :  { %1604 = vmatprep.subr.bf16.mxu1 %v1689_v0 }
0x1065   :  { %1599 = vmatpush3.bf16.msra.mxu0 %v1738_v3 }
0x106c   :  { %v1129_v54 = vpop.permute.xlu1 %1128 }
0x111e   :  { %v1057_v37 = vpop.f32.mrf.mxu1 }
0x111f   :  { %v1058_v38 = vadd.f32 %v1807_v49, %v1057_v37 }
0x1120   :  { %v1578_v1 = vpop.f32.mrf.mxu1  ;;  %v1106_v39 = vpop.f32.mrf.mxu0 }
0x1121   :  { %1423 = vst [vmem:[%s2067_s5 + $0xa] sm:$0x3] %v1058_v38  ;;  %v1112_v40 = vadd.f32 %v1106_v39, %v1067_v36 }
0x1122   :  { %v1060_v41 = vpop.f32.mrf.mxu1  ;;  %v1586_v42 = vpop.f32.mrf.mxu0 }
0x1123   :  { %1673 = vtanh.f32 %v1112_v40  ;;  %v1426_v46 = vmul.f32 -1.442695, %v1112_v40 }
0x1124   :  { %v1579_v43 = vpop.f32.mrf.mxu1  ;;  %v1109_v3 = vpop.f32.mrf.mxu0 }
0x1125   :  { %1675 = vpow2.f32 %v1426_v46 }
0x1126   :  { %v1587_v44 = vpop.f32.mrf.mxu0 }
0x1130   :  { %v1674_v45 = vpop.eup %1673 }
0x1131   :  { %1133 = vrot.lane.b32.xlu0 %v1674_v45, %s1692_s23 }
0x1132   :  { %v1676_v47 = vpop.eup %1675 }
0x1133   :  { %v1116_v48 = vadd.f32 1.0, %v1676_v47 }
0x1135   :  { %1677 = vrcp.f32 %v1116_v48 }
0x1142   :  { %v1678_v50 = vpop.eup %1677 }
0x1143   :  { %v1131_v55 = vmul.f32 %v1678_v50, %v1129_v54 }
0x11a3   :  { %v1134_v51 = vpop.permute.xlu0 %1133 }
0x11a4   :  { %v1136_v52 = vmul.f32 %v1678_v50, %v1134_v51 }
0x11a6   :  { %1138 = vrot.lane.b32.xlu0 %v1136_v52, %s1693_s24 }
0x11aa   :  { %1153 = vperm.xlu0 %1620, %v1427_v53  }
0x1218   :  { %v1139_v56 = vpop.permute.xlu0 %1138 }
0x1219   :  { %v1141_v57 = vadd.f32 %v1139_v56, %v1131_v55 }
0x121b   :  { %1679 = vtanh.f32 %v1141_v57  ;;  %v1163_v60 = vrot.slane %v1141_v57, %v1775_v32 }
0x1225   :  { %v1154_v4 = vpop.permute.xlu0 %1153 }
0x1228   :  { %v1680_v58 = vpop.eup %1679 }
0x1229   :  { %1144 = vrot.lane.b32.xlu1 %v1680_v58, %s1692_s23 }
0x122d   :  { %1170 = vperm.xlu1 %1619, %v1150_v59  }
0x1231   :  { %1164 = vrot.lane.b32.xlu1 %v1163_v60, %s1695_s3 }
0x129b   :  { %v1145_v61 = vpop.permute.xlu1 %1144 }
0x129c   :  { %v1147_v62 = vmul.f32 %v1678_v50, %v1145_v61 }
0x129e   :  { %v1182_v63 = vrot.slane %v1147_v62, %v1775_v32 }
0x12a0   :  { %1183 = vrot.lane.b32.xlu0 %v1182_v63, %s1693_s24 }
0x12a8   :  { %v1171_v2 = vpop.permute.xlu1 %1170 }
0x12a9   :  { %v1173_v6 = vmul.f32 %v1171_v2, %v1991_v26  ;;  %v1187_v11 = vmul.f32 %v1171_v2, %v1997_v31 }
0x12ac   :  { %v1165_v5 = vpop.permute.xlu1 %1164 }
0x12ad   :  { %v1167_v7 = vmul.f32 %v1165_v5, %v1154_v4 }
0x12af   :  { %v1174_v8 = vadd.f32 %v1173_v6, %v1167_v7 }
0x12b1   :  { %v1297_v9 = vrot.slane %v1174_v8, %v1775_v32 }
0x12b3   :  { %1298 = vrot.lane.b32.xlu1 %v1297_v9, %s1693_s24 }
0x1312   :  { %v1184_v10 = vpop.permute.xlu0 %1183 }
0x1313   :  { %v1186_v12 = vmul.f32 %v1184_v10, %v1154_v4 }
0x1315   :  { %v1188_v13 = vadd.f32 %v1187_v11, %v1186_v12  ;;  %v1189_v14 = vpack.c.bf16 %v1186_v12, %v1186_v12 }
0x1317   :  { %v1238_v15 = vpack.c.bf16 %v1188_v13, %v1188_v13  ;;  %1593 = vmatmul.mubr.msk.bf16.vlgmr.msra.gmra.mxu1 %vm44_vm1, %v1189_v14 }
0x1318   :  { %1605 = vmatpush3.bf16.msra.mxu1 %v1764_v24  ;;  %1608 = vmatprep.mubr.msk.bf16.mxu1 %vm1690_vm0, %v1689_v0 }
0x1319   :  { %1601 = vmatmul.mubr.msk.bf16.vlgmr.msra.gmra.mxu0 %vm44_vm1, %v1238_v15  ;;  %1606 = vmatprep.subr.bf16.mxu1 %v1689_v0 }
0x131c   :  { %1607 = vmatpush3.bf16.msra.mxu1 %v1771_v25 }
0x1325   :  { %v1299_v36 = vpop.permute.xlu1 %1298 }
0x13d7   :  { %v1227_v18 = vpop.f32.mrf.mxu1 }
0x13d8   :  { %v1228_v19 = vadd.f32 %v1807_v49, %v1227_v18 }
0x13d9   :  { %v1594_v20 = vpop.f32.mrf.mxu1  ;;  %v1276_v21 = vpop.f32.mrf.mxu0 }
0x13da   :  { %1429 = vst [vmem:[%s2067_s5 + $0xc] sm:$0x3] %v1228_v19  ;;  %v1282_v24 = vadd.f32 %v1276_v21, %v1237_v17 }
0x13db   :  { %v1230_v22 = vpop.f32.mrf.mxu1  ;;  %v1602_v23 = vpop.f32.mrf.mxu0 }
0x13dc   :  { %1681 = vtanh.f32 %v1282_v24  ;;  %v1432_v28 = vmul.f32 -1.442695, %v1282_v24 }
0x13dd   :  { %v1595_v0 = vpop.f32.mrf.mxu1  ;;  %v1279_v25 = vpop.f32.mrf.mxu0 }
0x13de   :  { %1683 = vpow2.f32 %v1432_v28 }
0x13df   :  { %v1603_v26 = vpop.f32.mrf.mxu0 }
0x13e9   :  { %v1682_v27 = vpop.eup %1681 }
0x13ea   :  { %1303 = vrot.lane.b32.xlu0 %v1682_v27, %s1692_s23 }
0x13eb   :  { %v1684_v29 = vpop.eup %1683 }
0x13ec   :  { %v1286_v30 = vadd.f32 1.0, %v1684_v29 }
0x13ee   :  { %1685 = vrcp.f32 %v1286_v30 }
0x13fb   :  { %v1686_v31 = vpop.eup %1685 }
0x13fc   :  { %v1301_v37 = vmul.f32 %v1686_v31, %v1299_v36 }
0x145c   :  { %v1304_v33 = vpop.permute.xlu0 %1303 }
0x145d   :  { %v1306_v34 = vmul.f32 %v1686_v31, %v1304_v33 }
0x145f   :  { %1308 = vrot.lane.b32.xlu0 %v1306_v34, %s1693_s24 }
0x1463   :  { %1322 = vperm.xlu0 %1620, %v1433_v35  }
0x14d1   :  { %v1309_v38 = vpop.permute.xlu0 %1308 }
0x14d2   :  { %v1311_v1 = vadd.f32 %v1309_v38, %v1301_v37 }
0x14d4   :  { %1687 = vtanh.f32 %v1311_v1 }
0x14de   :  { %v1323_v43 = vpop.permute.xlu0 %1322 }
0x14e1   :  { %v1688_v39 = vpop.eup %1687 }
0x14e2   :  { %1314 = vrot.lane.b32.xlu1 %v1688_v39, %s1692_s23 }
0x1554   :  { %v1315_v40 = vpop.permute.xlu1 %1314 }
0x1555   :  { %v1317_v41 = vmul.f32 %v1686_v31, %v1315_v40 }
0x1557   :  { %v1332_v42 = vrot.slane %v1317_v41, %v1775_v32 }
0x1559   :  { %1333 = vrot.lane.b32.xlu1 %v1332_v42, %s1693_s24 }
0x15cb   :  { %v1334_v3 = vpop.permute.xlu1 %1333 }
0x15cc   :  { %v1336_v44 = vmul.f32 %v1334_v3, %v1323_v43 }
0x15ce   :  { %v1337_v45 = vpack.c.bf16 %v1336_v44, %v1336_v44 }
0x15d0   :  { %1609 = vmatmul.mubr.msk.bf16.vlgmr.msra.gmra.mxu1 %vm44_vm1, %v1337_v45 }
0x1690   :  { %v1375_v46 = vpop.f32.mrf.mxu1 }
0x1691   :  { %v1376_v47 = vadd.f32 %v1807_v49, %v1375_v46 }
0x1692   :  { %v1610_v48 = vpop.f32.mrf.mxu1 }
0x1693   :  { %1435 = vst [vmem:[%s2067_s5 + $0xe] sm:$0x3] %v1376_v47 }
0x1694   :  { %v1378_v50 = vpop.f32.mrf.mxu1 }
0x1696   :  { %v1611_v51 = vpop.f32.mrf.mxu1 }

</bundles_post_ra>
